<compile_context>
chip_gen: v7x
topology: tpu7x:2x2x1
jax: 0.10.0
libtpu: 0.0.40
codegen_flags: <defaults>
</compile_context>

<pallas_src>
import functools

import jax
import jax.numpy as jnp
from jax import lax
from jax.experimental import pallas as pl
from jax.experimental.pallas import tpu as pltpu


def _round_up(x, m):
    return (x + m - 1) // m * m


# ---------------------------------------------------------------------------
# Kernel 1: key match -> per-output-voxel source index (or sentinel)
# ---------------------------------------------------------------------------
def _match_kernel(out_key_ref, in_key_ref, idx_ref, best_ref, *, tk, sentinel):
    """Grid = (n_out_tiles, n_in_tiles); reduction over input-key tiles.

    best_ref (VMEM scratch, int32 (tm, 1)) carries the running minimum
    matching global input index; `sentinel` (= index of the appended default
    row) if no match has been seen yet.
    """
    k = pl.program_id(1)

    @pl.when(k == 0)
    def _():
        best_ref[...] = jnp.full_like(best_ref, sentinel)

    out_keys = out_key_ref[...]                       # (tm, 1) int32
    tm = out_keys.shape[0]
    base = k * tk                                     # global offset of this key tile
    n_chunks = tk // 128

    # Hoisted out of the (unrolled) chunk loop: JAX does not CSE broadcasts.
    lane = lax.broadcasted_iota(jnp.int32, (1, 128), 1)

    # Chunk the (tm, tk) compare into (tm, 128) slabs so the live intermediate
    # stays within a few dozen vregs (no spill loop); unrolled for LLO.
    def body(c, cur_min):
        start = pl.multiple_of(c * 128, 128)
        in_chunk = in_key_ref[:, pl.ds(start, 128)]   # (1, 128)
        match = out_keys == in_chunk                  # (tm, 128) bool
        gidx = base + start + lane                    # global input-voxel index
        cand = jnp.where(match, gidx, jnp.int32(sentinel))
        return jnp.minimum(cur_min, jnp.min(cand, axis=-1, keepdims=True))

    init = jnp.full((tm, 1), sentinel, jnp.int32)
    cur = lax.fori_loop(0, n_chunks, body, init, unroll=True)
    best_ref[...] = jnp.minimum(best_ref[...], cur)

    @pl.when(k == pl.num_programs(1) - 1)
    def _():
        idx_ref[...] = best_ref[...]


# ---------------------------------------------------------------------------
# Kernel 2: one-shot row gather (indices arrive via scalar prefetch)
# ---------------------------------------------------------------------------
def _gather_kernel(idx_smem, *refs, rows_per_step):
    """refs = (feat_ref_0, ..., feat_ref_{R-1}, out_ref).

    Each feat_ref_r is a (1, C) block of the extended feature table whose row
    was chosen data-dependently by the BlockSpec index map (scalar prefetch).
    """
    del idx_smem                       # consumed only by the index maps
    out_ref = refs[-1]
    for r in range(rows_per_step):
        out_ref[r, :] = refs[r][0, :]


# ---------------------------------------------------------------------------
# Wrapper (plain-JAX glue + pallas_calls)
# ---------------------------------------------------------------------------
def encode_coords(coords, grid_size):
    """(batch, i, j, k) int32 -> unique non-negative int32 key (plain-JAX glue).

    Assumes coordinates in [0, grid_size); keys are >= 0 so the negative
    sentinel pad keys below can never collide with real voxels.
    """
    b, i, j, k = coords[:, 0], coords[:, 1], coords[:, 2], coords[:, 3]
    s = jnp.int32(grid_size)
    return ((b * s + i) * s + j) * s + k


def fill_from_grid(in_feats, in_coords, out_coords, *, grid_size,
                   default_value=0.0, tm=256, tk=1024, rows_per_step=8):
    n_in, c = in_feats.shape
    n_out = out_coords.shape[0]

    # int32 key-overflow guard (per batch element; the batch count multiplies
    # the key range too — keep B * grid_size**3 < 2**31 when sizing real grids).
    assert int(grid_size) ** 3 < 2 ** 31, "encode_coords: int32 key overflow"

    # Tile sizes: clamp to the (padded) problem so tiny inputs don't over-pad.
    tm_eff = min(tm, _round_up(n_out, rows_per_step))   # multiple of 8
    tk_eff = min(tk, _round_up(n_in, 128))              # multiple of 128
    n_out_pad = _round_up(n_out, tm_eff)
    n_in_pad = _round_up(n_in, tk_eff)

    # Sentinel pad keys: real keys are >= 0; -1 (input pad) and -2 (output pad)
    # never match anything, so pad rows never produce spurious gathers.
    out_keys = encode_coords(out_coords, grid_size)
    in_keys = encode_coords(in_coords, grid_size)
    out_keys_p = (jnp.full((n_out_pad,), -2, jnp.int32)
                  .at[:n_out].set(out_keys).reshape(n_out_pad, 1))
    in_keys_p = (jnp.full((n_in_pad,), -1, jnp.int32)
                 .at[:n_in].set(in_keys).reshape(1, n_in_pad))

    sentinel = n_in                      # index of the appended "default" row
    grid_m = n_out_pad // tm_eff
    grid_k = n_in_pad // tk_eff

    match_idx = pl.pallas_call(
        functools.partial(_match_kernel, tk=tk_eff, sentinel=sentinel),
        out_shape=jax.ShapeDtypeStruct((n_out_pad, 1), jnp.int32),
        grid_spec=pltpu.PrefetchScalarGridSpec(
            num_scalar_prefetch=0,
            grid=(grid_m, grid_k),
            in_specs=[
                pl.BlockSpec((tm_eff, 1), lambda i, k: (i, 0)),   # target keys
                pl.BlockSpec((1, tk_eff), lambda i, k: (0, k)),   # source keys
            ],
            out_specs=pl.BlockSpec((tm_eff, 1), lambda i, k: (i, 0)),
            scratch_shapes=[pltpu.VMEM((tm_eff, 1), jnp.int32)],
        ),
        compiler_params=pltpu.CompilerParams(
            dimension_semantics=("parallel", "arbitrary"),
            vmem_limit_bytes=32 * 1024 * 1024),
        cost_estimate=pl.CostEstimate(
            flops=n_out_pad * n_in_pad,
            transcendentals=0,
            bytes_accessed=4 * (n_out_pad * grid_k + n_in_pad * grid_m
                                + n_out_pad)),
    )(out_keys_p, in_keys_p)

    # Plain-JAX glue: flatten + clamp (belt-and-suspenders against OOB gather).
    gather_idx = jnp.clip(match_idx.reshape(n_out_pad), 0, sentinel)

    # Feature table extended by one "default" row at index `sentinel`.
    feats_ext = jnp.concatenate(
        [in_feats, jnp.full((1, c), default_value, dtype=in_feats.dtype)],
        axis=0)

    R = rows_per_step

    def _row_spec(r):
        # index_map gets (grid idx, *scalar-prefetch refs); block row size is 1
        # so the returned block index is the (data-dependent) source row index.
        return pl.BlockSpec((1, c),
                            lambda i, idx_ref, r=r: (idx_ref[i * R + r], 0))

    gathered = pl.pallas_call(
        functools.partial(_gather_kernel, rows_per_step=R),
        out_shape=jax.ShapeDtypeStruct((n_out_pad, c), in_feats.dtype),
        grid_spec=pltpu.PrefetchScalarGridSpec(
            num_scalar_prefetch=1,
            grid=(n_out_pad // R,),
            in_specs=[_row_spec(r) for r in range(R)],
            out_specs=pl.BlockSpec((R, c), lambda i, idx_ref: (i, 0)),
        ),
        compiler_params=pltpu.CompilerParams(
            dimension_semantics=("parallel",),
            vmem_limit_bytes=32 * 1024 * 1024),
        cost_estimate=pl.CostEstimate(
            flops=n_out_pad * c,
            transcendentals=0,
            bytes_accessed=2 * n_out_pad * c * in_feats.dtype.itemsize),
    )(gather_idx, *([feats_ext] * R))

    return gathered[:n_out]


class FillFromGrid:
    """Mirror of fvdb.nn.FillFromGrid forward semantics (synthetic grids).

    `input` / `other` are dicts: {"coords": int32 [N,4], "data": f32 [N,C]}.
    If `other` is None the input is returned unchanged (matches PyTorch path).
    """

    def __init__(self, default_value: float = 0.0):
        self.default_value = default_value

    def __call__(self, input, other=None, *, grid_size):
        if other is None:
            return input
        new_feature = fill_from_grid(
            input["data"], input["coords"], other["coords"],
            grid_size=grid_size, default_value=self.default_value)
        # TODO(synk): kmap/grid passthrough of the other VDBTensor is metadata
        # only (no compute) and is not represented here.
        return {"coords": other["coords"], "data": new_feature}


# ---------------------------------------------------------------------------
# Reference (pure JAX) for verification
# ---------------------------------------------------------------------------
def _reference(in_feats, in_coords, out_coords, grid_size, default_value):
    in_keys = encode_coords(in_coords, grid_size)
    out_keys = encode_coords(out_coords, grid_size)
    eq = out_keys[:, None] == in_keys[None, :]
    idx = jnp.argmax(eq, axis=1)
    found = eq.any(axis=1)
    gathered = in_feats[idx]
    return jnp.where(found[:, None], gathered,
                     jnp.asarray(default_value, in_feats.dtype))


# ---------------------------------------------------------------------------
if __name__ == "__main__":
    key = jax.random.PRNGKey(0)
    k1, k2, k3 = jax.random.split(key, 3)

    B, S, C = 2, 8, 32          # batch, dense-grid side, feature channels
    N_IN, N_OUT = 128, 256      # active voxels in input grid / other grid

    # Deterministic, unique voxel coordinates drawn from a B x S x S x S grid.
    total = B * S * S * S
    lin_in = jax.random.permutation(k1, total)[:N_IN]
    lin_out = jax.random.permutation(k2, total)[:N_OUT]

    def lin_to_coords(lin):
        b = lin // (S * S * S)
        r = lin % (S * S * S)
        i = r // (S * S)
        j = (r // S) % S
        kk = r % S
        return jnp.stack([b, i, j, kk], axis=-1).astype(jnp.int32)

    in_coords = lin_to_coords(lin_in)     # [128, 4]
    out_coords = lin_to_coords(lin_out)   # [256, 4]
    in_feats = jax.random.normal(k3, (N_IN, C), dtype=jnp.float32)

    input_tensor = {"coords": in_coords, "data": in_feats}
    other_tensor = {"coords": out_coords, "data": None}

    # Test 1: default_value = 0.0
    module0 = FillFromGrid(default_value=0.0)
    out0 = module0(input_tensor, other_tensor, grid_size=S)
    result0 = jax.block_until_ready(out0["data"])
    ref0 = _reference(in_feats, in_coords, out_coords, S, 0.0)
    assert result0.shape == (N_OUT, C)
    assert jnp.allclose(result0, ref0, atol=1e-6, rtol=1e-6)

    # Test 2: non-zero default fill value (exercises the appended default row).
    module1 = FillFromGrid(default_value=-3.5)
    out1 = module1(input_tensor, other_tensor, grid_size=S)
    result1 = jax.block_until_ready(out1["data"])
    ref1 = _reference(in_feats, in_coords, out_coords, S, -3.5)
    assert jnp.allclose(result1, ref1, atol=1e-6, rtol=1e-6)

    # other=None path returns input unchanged.
    assert module0(input_tensor, None, grid_size=S) is input_tensor

    print("KERNEL_OK")
</pallas_src>

<mosaic_0001>
module attributes {stable_mosaic.version = 11 : i64} {
  func.func @_match_kernel(%arg0: i32, %arg1: i32, %arg2: memref<256x1xi32, #tpu.memory_space<vmem>>, %arg3: memref<1x128xi32, #tpu.memory_space<vmem>>, %arg4: memref<256x1xi32, #tpu.memory_space<vmem>>, %arg5: memref<256x1xi32, #tpu.memory_space<vmem>>) attributes {dimension_semantics = [#tpu.dimension_semantics<parallel>, #tpu.dimension_semantics<arbitrary>], iteration_bounds = array<i64: 1, 1>, scalar_prefetch = 0 : i64, scratch_operands = 1 : i64, tpu.core_type = #tpu.core_type<tc>, window_params = [{transform_indices = @transform_0, window_bounds = array<i64: 256, 1>}, {transform_indices = @transform_1, window_bounds = array<i64: 1, 128>}, {transform_indices = @transform_2, window_bounds = array<i64: 256, 1>}]} {
    %c0_i32 = arith.constant 0 : i32
    %0 = arith.cmpi eq, %arg1, %c0_i32 : i32
    %1 = arith.extui %0 : i1 to i32
    %c0_i32_0 = arith.constant 0 : i32
    %2 = arith.cmpi ne, %1, %c0_i32_0 : i32
    scf.if %2 {
      %c128_i32_13 = arith.constant 128 : i32
      %30 = vector.broadcast %c128_i32_13 : i32 to vector<256x1xi32>
      %c0_14 = arith.constant 0 : index
      %c0_15 = arith.constant 0 : index
      %31 = vector.load %arg5[%c0_14, %c0_15] : memref<256x1xi32, #tpu.memory_space<vmem>>, vector<256x1xi32>
      tpu.vector_store %arg5[%c0_14, %c0_15], %30 {strides = array<i32>} : memref<256x1xi32, #tpu.memory_space<vmem>>, vector<256x1xi32>,
    } else {
    }
    %c0 = arith.constant 0 : index
    %c0_1 = arith.constant 0 : index
    %3 = vector.load %arg2[%c0, %c0_1] : memref<256x1xi32, #tpu.memory_space<vmem>>, vector<256x1xi32>
    %c128_i32 = arith.constant 128 : i32
    %4 = arith.muli %arg1, %c128_i32 : i32
    %5 = tpu.iota {dimensions = array<i32: 1>} : vector<1x128xi32>
    %c128_i32_2 = arith.constant 128 : i32
    %6 = vector.broadcast %c128_i32_2 : i32 to vector<256x1xi32>
    %c0_i32_3 = arith.constant 0 : i32
    %c128_i32_4 = arith.constant 128 : i32
    %7 = arith.muli %c0_i32_3, %c128_i32_4 : i32
    %8 = tpu.assume_multiple %7, 128 : i32
    %c0_5 = arith.constant 0 : index
    %9 = arith.index_cast %8 : i32 to index
    %10 = vector.load %arg3[%c0_5, %9] : memref<1x128xi32, #tpu.memory_space<vmem>>, vector<1x128xi32>
    %11 = vector.broadcast %3 : vector<256x1xi32> to vector<256x128xi32>
    %12 = vector.broadcast %10 : vector<1x128xi32> to vector<256x128xi32>
    %13 = arith.cmpi eq, %11, %12 : vector<256x128xi32>
    %14 = arith.addi %4, %8 : i32
    %15 = vector.broadcast %14 : i32 to vector<1x128xi32>
    %16 = arith.addi %15, %5 : vector<1x128xi32>
    %c128_i32_6 = arith.constant 128 : i32
    %17 = vector.shape_cast %16 : vector<1x128xi32> to vector<1x128xi32>
    %18 = vector.broadcast %17 : vector<1x128xi32> to vector<256x128xi32>
    %19 = vector.broadcast %c128_i32_6 : i32 to vector<256x128xi32>
    %20 = arith.select %13, %18, %19 : vector<256x128xi1>, vector<256x128xi32>
    %cst = arith.constant dense<2147483647> : vector<256xi32>
    %21 = vector.multi_reduction <minsi>, %20, %cst [1] : vector<256x128xi32> to vector<256xi32>
    %22 = vector.shape_cast %21 : vector<256xi32> to vector<256x1xi32>
    %23 = arith.minsi %6, %22 : vector<256x1xi32>
    %c1_i32 = arith.constant 1 : i32
    %c0_7 = arith.constant 0 : index
    %c0_8 = arith.constant 0 : index
    %24 = vector.load %arg5[%c0_7, %c0_8] : memref<256x1xi32, #tpu.memory_space<vmem>>, vector<256x1xi32>
    %25 = arith.minsi %24, %23 : vector<256x1xi32>
    %c0_9 = arith.constant 0 : index
    %c0_10 = arith.constant 0 : index
    %26 = vector.load %arg5[%c0_9, %c0_10] : memref<256x1xi32, #tpu.memory_space<vmem>>, vector<256x1xi32>
    tpu.vector_store %arg5[%c0_9, %c0_10], %25 {strides = array<i32>} : memref<256x1xi32, #tpu.memory_space<vmem>>, vector<256x1xi32>,
    %c0_i32_11 = arith.constant 0 : i32
    %27 = arith.cmpi eq, %arg1, %c0_i32_11 : i32
    %28 = arith.extui %27 : i1 to i32
    %c0_i32_12 = arith.constant 0 : i32
    %29 = arith.cmpi ne, %28, %c0_i32_12 : i32
    scf.if %29 {
      %c0_13 = arith.constant 0 : index
      %c0_14 = arith.constant 0 : index
      %30 = vector.load %arg5[%c0_13, %c0_14] : memref<256x1xi32, #tpu.memory_space<vmem>>, vector<256x1xi32>
      %c0_15 = arith.constant 0 : index
      %c0_16 = arith.constant 0 : index
      %31 = vector.load %arg4[%c0_15, %c0_16] : memref<256x1xi32, #tpu.memory_space<vmem>>, vector<256x1xi32>
      tpu.vector_store %arg4[%c0_15, %c0_16], %30 {strides = array<i32>} : memref<256x1xi32, #tpu.memory_space<vmem>>, vector<256x1xi32>,
    } else {
    }
    return
  }
  func.func @transform_0(%arg0: i32, %arg1: i32) -> (i32, i32) {
    %c0_i32 = arith.constant 0 : i32
    %c0_i32_0 = arith.constant 0 : i32
    return %arg0, %c0_i32 : i32, i32
  }
  func.func @transform_1(%arg0: i32, %arg1: i32) -> (i32, i32) {
    %c0_i32 = arith.constant 0 : i32
    %c0_i32_0 = arith.constant 0 : i32
    return %c0_i32, %arg1 : i32, i32
  }
  func.func @transform_2(%arg0: i32, %arg1: i32) -> (i32, i32) {
    %c0_i32 = arith.constant 0 : i32
    %c0_i32_0 = arith.constant 0 : i32
    return %arg0, %c0_i32 : i32, i32
  }
}

</mosaic_0001>

<bundles_post_ra>
// kernel: tpu_custom_call.1
= control target key start
LH: loop header
LB: loop body
LE: loop exit
PB: predicated region body
PF: predicated region fallthrough
CT: control target
= control target key end

     0   :  { %v968_v0 = vmov 0   ;;  %v81_v33 = vlaneseq  ;;  %s1728_s0 = inlined_call_operand.vmem [shape: s32[256,1], index: 0, kind: input, shape index: {}]   ;;  %s1729_s1 = inlined_call_operand.vmem [shape: s32[1,128], index: 1, kind: input, shape index: {}]   ;;  %s1730_s2 = inlined_call_operand.vmem [shape: s32[256,1], index: 2, kind: output, shape index: {}]  }
   0x1   :  { %967 = vset.pattern.permute.xlu1 %v968_v0  ;;  %966 = vset.pattern.permute.xlu0 %v968_v0  ;;  %v50_v1 = vld [vmem:[%s1728_s0 + $0x10] sm:$0xff]  ;;  %v48_v2 = vld [vmem:[%s1728_s0] sm:$0xff]  ;;  %v51_v3 = vld [vmem:[%s1728_s0 + $0x18] sm:$0xff] }
   0x2   :  { %91 = vperm.xlu1 %967, %v50_v1   ;;  %85 = vperm.xlu0 %966, %v48_v2   ;;  %v49_v4 = vld [vmem:[%s1728_s0 + $0x8] sm:$0xff]  ;;  %v52_v6 = vld [vmem:[%s1728_s0 + $0x20] sm:$0xff]  ;;  %v55_v7 = vld [vmem:[%s1728_s0 + $0x38] sm:$0xff]  ;;  %v1081_v34 = vand.u32 127, %v81_v33 }
   0x3   :  { %v53_v5 = vld [vmem:[%s1728_s0 + $0x28] sm:$0xff]  ;;  %v54_v8 = vld [vmem:[%s1728_s0 + $0x30] sm:$0xff]  ;;  %v56_v10 = vld [vmem:[%s1728_s0 + $0x40] sm:$0xff] }
   0x4   :  { %v57_v9 = vld [vmem:[%s1728_s0 + $0x48] sm:$0xff]  ;;  %v59_v11 = vld [vmem:[%s1728_s0 + $0x58] sm:$0xff]  ;;  %v58_v12 = vld [vmem:[%s1728_s0 + $0x50] sm:$0xff] }
   0x5   :  { %v61_v13 = vld [vmem:[%s1728_s0 + $0x68] sm:$0xff]  ;;  %v60_v14 = vld [vmem:[%s1728_s0 + $0x60] sm:$0xff]  ;;  %v63_v15 = vld [vmem:[%s1728_s0 + $0x78] sm:$0xff] }
   0x6   :  { %94 = vperm.xlu1 %967, %v51_v3   ;;  %88 = vperm.xlu0 %966, %v49_v4   ;;  %v62_v16 = vld [vmem:[%s1728_s0 + $0x70] sm:$0xff]  ;;  %v65_v17 = vld [vmem:[%s1728_s0 + $0x88] sm:$0xff]  ;;  %v64_v18 = vld [vmem:[%s1728_s0 + $0x80] sm:$0xff] }
   0x7   :  { %v67_v19 = vld [vmem:[%s1728_s0 + $0x98] sm:$0xff]  ;;  %v66_v20 = vld [vmem:[%s1728_s0 + $0x90] sm:$0xff]  ;;  %v69_v21 = vld [vmem:[%s1728_s0 + $0xa8] sm:$0xff] }
   0x8   :  { %v68_v22 = vld [vmem:[%s1728_s0 + $0xa0] sm:$0xff]  ;;  %v71_v23 = vld [vmem:[%s1728_s0 + $0xb8] sm:$0xff]  ;;  %v70_v24 = vld [vmem:[%s1728_s0 + $0xb0] sm:$0xff] }
   0x9   :  { %v73_v25 = vld [vmem:[%s1728_s0 + $0xc8] sm:$0xff]  ;;  %v72_v26 = vld [vmem:[%s1728_s0 + $0xc0] sm:$0xff]  ;;  %v75_v27 = vld [vmem:[%s1728_s0 + $0xd8] sm:$0xff] }
   0xa   :  { %100 = vperm.xlu1 %967, %v53_v5   ;;  %97 = vperm.xlu0 %966, %v52_v6   ;;  %v74_v28 = vld [vmem:[%s1728_s0 + $0xd0] sm:$0xff]  ;;  %v77_v29 = vld [vmem:[%s1728_s0 + $0xe8] sm:$0xff]  ;;  %v76_v30 = vld [vmem:[%s1728_s0 + $0xe0] sm:$0xff] }
   0xb   :  { %v79_v31 = vld [vmem:[%s1728_s0 + $0xf8] sm:$0xff]  ;;  %v78_v32 = vld [vmem:[%s1728_s0 + $0xf0] sm:$0xff]  ;;  %v1086_v35 = vld [vmem:[%s1729_s1] ss:$0 sm:$0xff] }
   0xe   :  { %106 = vperm.xlu1 %967, %v55_v7   ;;  %103 = vperm.xlu0 %966, %v54_v8  }
  0x12   :  { %112 = vperm.xlu1 %967, %v57_v9   ;;  %109 = vperm.xlu0 %966, %v56_v10  }
  0x16   :  { %118 = vperm.xlu1 %967, %v59_v11   ;;  %115 = vperm.xlu0 %966, %v58_v12  }
  0x1a   :  { %124 = vperm.xlu1 %967, %v61_v13   ;;  %121 = vperm.xlu0 %966, %v60_v14  }
  0x1e   :  { %130 = vperm.xlu1 %967, %v63_v15   ;;  %127 = vperm.xlu0 %966, %v62_v16  }
  0x22   :  { %136 = vperm.xlu1 %967, %v65_v17   ;;  %133 = vperm.xlu0 %966, %v64_v18  }
  0x26   :  { %142 = vperm.xlu1 %967, %v67_v19   ;;  %139 = vperm.xlu0 %966, %v66_v20  }
  0x2a   :  { %148 = vperm.xlu1 %967, %v69_v21   ;;  %145 = vperm.xlu0 %966, %v68_v22  }
  0x2e   :  { %154 = vperm.xlu1 %967, %v71_v23   ;;  %151 = vperm.xlu0 %966, %v70_v24  }
  0x32   :  { %160 = vperm.xlu1 %967, %v73_v25   ;;  %157 = vperm.xlu0 %966, %v72_v26  }
  0x36   :  { %166 = vperm.xlu1 %967, %v75_v27   ;;  %163 = vperm.xlu0 %966, %v74_v28  }
  0x3a   :  { %172 = vperm.xlu1 %967, %v77_v29   ;;  %169 = vperm.xlu0 %966, %v76_v30  }
  0x3e   :  { %178 = vperm.xlu1 %967, %v79_v31   ;;  %175 = vperm.xlu0 %966, %v78_v32  }
  0x81   :  { %v92_v36 = vpop.permute.xlu1 %91  ;;  %v86_v37 = vpop.permute.xlu0 %85 }
  0x82   :  { %vm186_vm0 = vcmp.eq.s32.totalorder %v92_v36, %v1086_v35  ;;  %vm184_vm1 = vcmp.eq.s32.totalorder %v86_v37, %v1086_v35 }
  0x83   :  { %v1091_v38 = vsel %vm186_vm0, %v1081_v34, 128  ;;  %v1094_v39 = vsel %vm184_vm1, %v1081_v34, 128 }
  0x84   :  { %v252_v40 = vshra.s32 %v1094_v39, 16  ;;  %v280_v41 = vshra.s32 %v1091_v38, 16 }
  0x85   :  { %v95_v42 = vpop.permute.xlu1 %94  ;;  %v89_v43 = vpop.permute.xlu0 %88 }
  0x86   :  { %vm187_vm2 = vcmp.eq.s32.totalorder %v95_v42, %v1086_v35  ;;  %vm185_vm3 = vcmp.eq.s32.totalorder %v89_v43, %v1086_v35  ;;  %v1100_v44 = vcvt.s32.f32 %v252_v40  ;;  %v1109_v47 = vcvt.s32.f32 %v280_v41 }
  0x87   :  { %v1103_v45 = vsel %vm187_vm2, %v1081_v34, 128  ;;  %v1106_v46 = vsel %vm185_vm3, %v1081_v34, 128 }
  0x88   :  { %255 = vmin.xlane.f32.xlu0 %v1100_v44  ;;  %v266_v48 = vshra.s32 %v1106_v46, 16  ;;  %v294_v51 = vshra.s32 %v1103_v45, 16 }
  0x89   :  { %v101_v49 = vpop.permute.xlu1 %100  ;;  %v98_v50 = vpop.permute.xlu0 %97 }
  0x8a   :  { %vm189_vm4 = vcmp.eq.s32.totalorder %v101_v49, %v1086_v35  ;;  %vm188_vm5 = vcmp.eq.s32.totalorder %v98_v50, %v1086_v35  ;;  %v1115_v52 = vcvt.s32.f32 %v266_v48  ;;  %v1126_v58 = vcvt.s32.f32 %v294_v51 }
  0x8b   :  { %v1118_v53 = vsel %vm189_vm4, %v1081_v34, 128  ;;  %v1121_v54 = vsel %vm188_vm5, %v1081_v34, 128 }
  0x8c   :  { %283 = vmin.xlane.f32.xlu0 %v1109_v47  ;;  %269 = vmin.xlane.f32.xlu1 %v1115_v52  ;;  %v308_v55 = vshra.s32 %v1121_v54, 16  ;;  %v322_v60 = vshra.s32 %v1118_v53, 16 }
  0x8d   :  { %v107_v56 = vpop.permute.xlu1 %106  ;;  %v104_v57 = vpop.permute.xlu0 %103 }
  0x8e   :  { %vm191_vm6 = vcmp.eq.s32.totalorder %v107_v56, %v1086_v35  ;;  %vm190_vm7 = vcmp.eq.s32.totalorder %v104_v57, %v1086_v35  ;;  %v1130_v59 = vcvt.s32.f32 %v308_v55  ;;  %v1145_v3 = vcvt.s32.f32 %v322_v60 }
  0x8f   :  { %v1134_v61 = vsel %vm191_vm6, %v1081_v34, 128  ;;  %v1137_v62 = vsel %vm190_vm7, %v1081_v34, 128 }
  0x90   :  { %297 = vmin.xlane.f32.xlu0 %v1126_v58  ;;  %311 = vmin.xlane.f32.xlu1 %v1130_v59  ;;  %v336_v63 = vshra.s32 %v1137_v62, 16  ;;  %v350_v2 = vshra.s32 %v1134_v61, 16 }
  0x91   :  { %v113_v0 = vpop.permute.xlu1 %112  ;;  %v110_v1 = vpop.permute.xlu0 %109 }
  0x92   :  { %vm193_vm8 = vcmp.eq.s32.totalorder %v113_v0, %v1086_v35  ;;  %vm192_vm9 = vcmp.eq.s32.totalorder %v110_v1, %v1086_v35  ;;  %v1147_v4 = vcvt.s32.f32 %v336_v63  ;;  %v1158_v10 = vcvt.s32.f32 %v350_v2 }
  0x93   :  { %v1150_v5 = vsel %vm193_vm8, %v1081_v34, 128  ;;  %v1153_v6 = vsel %vm192_vm9, %v1081_v34, 128 }
  0x94   :  { %325 = vmin.xlane.f32.xlu0 %v1145_v3  ;;  %339 = vmin.xlane.f32.xlu1 %v1147_v4  ;;  %v364_v7 = vshra.s32 %v1153_v6, 16  ;;  %v378_v12 = vshra.s32 %v1150_v5, 16 }
  0x95   :  { %v119_v8 = vpop.permute.xlu1 %118  ;;  %v116_v9 = vpop.permute.xlu0 %115 }
  0x96   :  { %vm195_vm10 = vcmp.eq.s32.totalorder %v119_v8, %v1086_v35  ;;  %vm194_vm11 = vcmp.eq.s32.totalorder %v116_v9, %v1086_v35  ;;  %v1162_v11 = vcvt.s32.f32 %v364_v7  ;;  %v1177_v19 = vcvt.s32.f32 %v378_v12 }
  0x97   :  { %v1166_v13 = vsel %vm195_vm10, %v1081_v34, 128  ;;  %v1169_v14 = vsel %vm194_vm11, %v1081_v34, 128 }
  0x98   :  { %353 = vmin.xlane.f32.xlu0 %v1158_v10  ;;  %367 = vmin.xlane.f32.xlu1 %v1162_v11  ;;  %v392_v15 = vshra.s32 %v1169_v14, 16  ;;  %v406_v18 = vshra.s32 %v1166_v13, 16 }
  0x99   :  { %v125_v16 = vpop.permute.xlu1 %124  ;;  %v122_v17 = vpop.permute.xlu0 %121 }
  0x9a   :  { %vm197_vm12 = vcmp.eq.s32.totalorder %v125_v16, %v1086_v35  ;;  %vm196_vm13 = vcmp.eq.s32.totalorder %v122_v17, %v1086_v35  ;;  %v1179_v20 = vcvt.s32.f32 %v392_v15  ;;  %v1190_v26 = vcvt.s32.f32 %v406_v18 }
  0x9b   :  { %v1182_v21 = vsel %vm197_vm12, %v1081_v34, 128  ;;  %v1185_v22 = vsel %vm196_vm13, %v1081_v34, 128 }
  0x9c   :  { %381 = vmin.xlane.f32.xlu0 %v1177_v19  ;;  %395 = vmin.xlane.f32.xlu1 %v1179_v20  ;;  %v420_v23 = vshra.s32 %v1185_v22, 16  ;;  %v434_v28 = vshra.s32 %v1182_v21, 16 }
  0x9d   :  { %v131_v24 = vpop.permute.xlu1 %130  ;;  %v128_v25 = vpop.permute.xlu0 %127 }
  0x9e   :  { %vm199_vm14 = vcmp.eq.s32.totalorder %v131_v24, %v1086_v35  ;;  %vm198_vm15 = vcmp.eq.s32.totalorder %v128_v25, %v1086_v35  ;;  %v1194_v27 = vcvt.s32.f32 %v420_v23  ;;  %v1209_v37 = vcvt.s32.f32 %v434_v28 }
  0x9f   :  { %v1198_v29 = vsel %vm199_vm14, %v1081_v34, 128  ;;  %v1201_v30 = vsel %vm198_vm15, %v1081_v34, 128 }
  0xa0   :  { %409 = vmin.xlane.f32.xlu0 %v1190_v26  ;;  %423 = vmin.xlane.f32.xlu1 %v1194_v27  ;;  %v448_v31 = vshra.s32 %v1201_v30, 16  ;;  %v462_v36 = vshra.s32 %v1198_v29, 16 }
  0xa1   :  { %v137_v32 = vpop.permute.xlu1 %136  ;;  %v134_v33 = vpop.permute.xlu0 %133 }
  0xa2   :  { %vm201_vm0 = vcmp.eq.s32.totalorder %v137_v32, %v1086_v35  ;;  %vm200_vm1 = vcmp.eq.s32.totalorder %v134_v33, %v1086_v35  ;;  %v1211_v40 = vcvt.s32.f32 %v448_v31  ;;  %v1222_v50 = vcvt.s32.f32 %v462_v36 }
  0xa3   :  { %v1214_v41 = vsel %vm201_vm0, %v1081_v34, 128  ;;  %v1217_v42 = vsel %vm200_vm1, %v1081_v34, 128  ;;  %vm15_vm0 = vcmask 7168  }
  0xa4   :  { %437 = vmin.xlane.f32.xlu0 %v1209_v37  ;;  %451 = vmin.xlane.f32.xlu1 %v1211_v40  ;;  %v476_v43 = vshra.s32 %v1217_v42, 16  ;;  %v490_v55 = vshra.s32 %v1214_v41, 16 }
  0xa5   :  { %v143_v48 = vpop.permute.xlu1 %142  ;;  %v140_v49 = vpop.permute.xlu0 %139 }
  0xa6   :  { %vm203_vm2 = vcmp.eq.s32.totalorder %v143_v48, %v1086_v35  ;;  %vm202_vm3 = vcmp.eq.s32.totalorder %v140_v49, %v1086_v35  ;;  %v1226_v51 = vcvt.s32.f32 %v476_v43  ;;  %v1241_v2 = vcvt.s32.f32 %v490_v55 }
  0xa7   :  { %v1230_v56 = vsel %vm203_vm2, %v1081_v34, 128  ;;  %v1233_v57 = vsel %vm202_vm3, %v1081_v34, 128 }
  0xa8   :  { %465 = vmin.xlane.f32.xlu0 %v1222_v50  ;;  %479 = vmin.xlane.f32.xlu1 %v1226_v51  ;;  %v504_v60 = vshra.s32 %v1233_v57, 16  ;;  %v518_v1 = vshra.s32 %v1230_v56, 16 }
  0xa9   :  { %v149_v63 = vpop.permute.xlu1 %148  ;;  %v146_v0 = vpop.permute.xlu0 %145 }
  0xaa   :  { %vm205_vm4 = vcmp.eq.s32.totalorder %v149_v63, %v1086_v35  ;;  %vm204_vm5 = vcmp.eq.s32.totalorder %v146_v0, %v1086_v35  ;;  %v1243_v7 = vcvt.s32.f32 %v504_v60  ;;  %v1254_v17 = vcvt.s32.f32 %v518_v1 }
  0xab   :  { %v1246_v8 = vsel %vm205_vm4, %v1081_v34, 128  ;;  %v1249_v9 = vsel %vm204_vm5, %v1081_v34, 128 }
  0xac   :  { %493 = vmin.xlane.f32.xlu0 %v1241_v2  ;;  %507 = vmin.xlane.f32.xlu1 %v1243_v7  ;;  %v532_v12 = vshra.s32 %v1249_v9, 16  ;;  %v546_v23 = vshra.s32 %v1246_v8, 16 }
  0xad   :  { %v155_v15 = vpop.permute.xlu1 %154  ;;  %v152_v16 = vpop.permute.xlu0 %151 }
  0xae   :  { %vm207_vm6 = vcmp.eq.s32.totalorder %v155_v15, %v1086_v35  ;;  %vm206_vm7 = vcmp.eq.s32.totalorder %v152_v16, %v1086_v35  ;;  %v1258_v18 = vcvt.s32.f32 %v532_v12  ;;  %v1273_v36 = vcvt.s32.f32 %v546_v23 }
  0xaf   :  { %v1262_v24 = vsel %vm207_vm6, %v1081_v34, 128  ;;  %v1265_v25 = vsel %vm206_vm7, %v1081_v34, 128 }
  0xb0   :  { %521 = vmin.xlane.f32.xlu0 %v1254_v17  ;;  %535 = vmin.xlane.f32.xlu1 %v1258_v18  ;;  %v560_v28 = vshra.s32 %v1265_v25, 16  ;;  %v574_v33 = vshra.s32 %v1262_v24, 16 }
  0xb1   :  { %v161_v31 = vpop.permute.xlu1 %160  ;;  %v158_v32 = vpop.permute.xlu0 %157 }
  0xb2   :  { %vm209_vm8 = vcmp.eq.s32.totalorder %v161_v31, %v1086_v35  ;;  %vm208_vm9 = vcmp.eq.s32.totalorder %v158_v32, %v1086_v35  ;;  %v1275_v43 = vcvt.s32.f32 %v560_v28  ;;  %v1286_v0 = vcvt.s32.f32 %v574_v33 }
  0xb3   :  { %v1278_v48 = vsel %vm209_vm8, %v1081_v34, 128  ;;  %v1281_v49 = vsel %vm208_vm9, %v1081_v34, 128 }
  0xb4   :  { %549 = vmin.xlane.f32.xlu0 %v1273_v36  ;;  %563 = vmin.xlane.f32.xlu1 %v1275_v43  ;;  %v588_v55 = vshra.s32 %v1281_v49, 16  ;;  %1741 = vst [vmem:[#allocation3_spill] sm:$0xff] %v1286_v0  ;;  %v602_v12 = vshra.s32 %v1278_v48, 16 }
  0xb5   :  { %v167_v60 = vpop.permute.xlu1 %166  ;;  %v164_v63 = vpop.permute.xlu0 %163 }
  0xb6   :  { %vm211_vm10 = vcmp.eq.s32.totalorder %v167_v60, %v1086_v35  ;;  %vm210_vm11 = vcmp.eq.s32.totalorder %v164_v63, %v1086_v35  ;;  %v1290_v1 = vcvt.s32.f32 %v588_v55  ;;  %v1305_v33 = vcvt.s32.f32 %v602_v12 }
  0xb7   :  { %v1294_v15 = vsel %vm211_vm10, %v1081_v34, 128  ;;  %v1297_v16 = vsel %vm210_vm11, %v1081_v34, 128 }
  0xb8   :  { %1742 = vst [vmem:[#allocation4_spill] sm:$0xff] %v1290_v1  ;;  %1743 = vst [vmem:[#allocation5_spill] sm:$0xff] %v1294_v15  ;;  %577 = vmin.xlane.f32.xlu0 %v1286_v0  ;;  %591 = vmin.xlane.f32.xlu1 %v1290_v1  ;;  %v616_v23 = vshra.s32 %v1297_v16, 16  ;;  %v630_v32 = vshra.s32 %v1294_v15, 16 }
  0xb9   :  { %v173_v28 = vpop.permute.xlu1 %172  ;;  %v170_v31 = vpop.permute.xlu0 %169  ;;  %1744 = vst [vmem:[#allocation6_spill] sm:$0xff] %v1305_v33 }
  0xba   :  { %vm213_vm12 = vcmp.eq.s32.totalorder %v173_v28, %v1086_v35  ;;  %vm212_vm13 = vcmp.eq.s32.totalorder %v170_v31, %v1086_v35  ;;  %v1307_v55 = vcvt.s32.f32 %v616_v23  ;;  %v1318_v1 = vcvt.s32.f32 %v630_v32 }
  0xbb   :  { %v1310_v60 = vsel %vm213_vm12, %v1081_v34, 128  ;;  %v1313_v63 = vsel %vm212_vm13, %v1081_v34, 128 }
  0xbc   :  { %1745 = vst [vmem:[#allocation7_spill] sm:$0xff] %v1307_v55  ;;  %605 = vmin.xlane.f32.xlu0 %v1305_v33  ;;  %619 = vmin.xlane.f32.xlu1 %v1307_v55  ;;  %v644_v15 = vshra.s32 %v1313_v63, 16  ;;  %1746 = vst [vmem:[#allocation8_spill] sm:$0xff] %v1318_v1  ;;  %v658_v23 = vshra.s32 %v1310_v60, 16 }
  0xbd   :  { %v179_v0 = vpop.permute.xlu1 %178  ;;  %v176_v28 = vpop.permute.xlu0 %175 }
  0xbe   :  { %vm215_vm14 = vcmp.eq.s32.totalorder %v179_v0, %v1086_v35  ;;  %vm214_vm15 = vcmp.eq.s32.totalorder %v176_v28, %v1086_v35  ;;  %v1322_v12 = vcvt.s32.f32 %v644_v15  ;;  %v1334_v55 = vcvt.s32.f32 %v658_v23 }
  0xbf   :  { %v1326_v31 = vsel %vm215_vm14, %v1081_v34, 128  ;;  %v1329_v33 = vsel %vm214_vm15, %v1081_v34, 128  ;;  %v969_v34 = vmov 128   ;;  %v251_v28 = vand.u32 65535, %v1094_v39 }
  0xc0   :  { %1747 = vst [vmem:[#allocation9_spill] sm:$0xff] %v1326_v31  ;;  %633 = vmin.xlane.f32.xlu0 %v1318_v1  ;;  %647 = vmin.xlane.f32.xlu1 %v1322_v12  ;;  %v672_v32 = vshra.s32 %v1329_v33, 16  ;;  %1748 = vst [vmem:[#allocation10_spill] sm:$0xff] %v1334_v55  ;;  %v686_v35 = vshra.s32 %v1326_v31, 16  ;;  %v279_v23 = vand.u32 65535, %v1091_v38  ;;  %v307_v31 = vand.u32 65535, %v1121_v54 }
  0xc1   :  { %16 = vst.msk [vmem:[#allocation2] sm:$0xff] %vm15_vm0, %v969_v34  ;;  %17 = vst.msk [vmem:[#allocation2 + $0x8] sm:$0xff] %vm15_vm0, %v969_v34  ;;  %v335_v54 = vand.u32 65535, %v1137_v62  ;;  %v363_v62 = vand.u32 65535, %v1153_v6  ;;  %v391_v6 = vand.u32 65535, %v1169_v14  ;;  %v419_v14 = vand.u32 65535, %v1185_v22 }
  0xc2   :  { %v1336_v0 = vcvt.s32.f32 %v672_v32  ;;  %v1341_v15 = vcvt.s32.f32 %v686_v35  ;;  %18 = vst.msk [vmem:[#allocation2 + $0x10] sm:$0xff] %vm15_vm0, %v969_v34  ;;  %19 = vst.msk [vmem:[#allocation2 + $0x18] sm:$0xff] %vm15_vm0, %v969_v34  ;;  %v265_v32 = vand.u32 65535, %v1106_v46  ;;  %v281_v38 = vcvt.s32.f32 %v279_v23 }
  0xc3   :  { %20 = vst.msk [vmem:[#allocation2 + $0x20] sm:$0xff] %vm15_vm0, %v969_v34  ;;  %21 = vst.msk [vmem:[#allocation2 + $0x28] sm:$0xff] %vm15_vm0, %v969_v34  ;;  %v447_v22 = vand.u32 65535, %v1201_v30  ;;  %v475_v30 = vand.u32 65535, %v1217_v42  ;;  %v503_v42 = vand.u32 65535, %v1233_v57  ;;  %v531_v57 = vand.u32 65535, %v1249_v9 }
  0xc4   :  { %1749 = vst [vmem:[#allocation11_spill] sm:$0xff] %v1336_v0  ;;  %661 = vmin.xlane.f32.xlu0 %v1334_v55  ;;  %675 = vmin.xlane.f32.xlu1 %v1336_v0  ;;  %1750 = vst [vmem:[#allocation12_spill] sm:$0xff] %v1341_v15  ;;  %v293_v0 = vand.u32 65535, %v1103_v45  ;;  %v267_v39 = vcvt.s32.f32 %v265_v32  ;;  %v321_v45 = vand.u32 65535, %v1118_v53  ;;  %v349_v53 = vand.u32 65535, %v1134_v61 }
  0xc5   :  { %22 = vst.msk [vmem:[#allocation2 + $0x30] sm:$0xff] %vm15_vm0, %v969_v34  ;;  %23 = vst.msk [vmem:[#allocation2 + $0x38] sm:$0xff] %vm15_vm0, %v969_v34  ;;  %v377_v61 = vand.u32 65535, %v1150_v5  ;;  %v405_v5 = vand.u32 65535, %v1166_v13  ;;  %v433_v13 = vand.u32 65535, %v1182_v21  ;;  %v461_v21 = vand.u32 65535, %v1198_v29 }
  0xc6   :  { %24 = vst.msk [vmem:[#allocation2 + $0x40] sm:$0xff] %vm15_vm0, %v969_v34  ;;  %25 = vst.msk [vmem:[#allocation2 + $0x48] sm:$0xff] %vm15_vm0, %v969_v34  ;;  %v295_v23 = vcvt.s32.f32 %v293_v0  ;;  %v323_v0 = vcvt.s32.f32 %v321_v45  ;;  %v351_v45 = vcvt.s32.f32 %v349_v53  ;;  %v489_v29 = vand.u32 65535, %v1214_v41 }
  0xc7   :  { %26 = vst.msk [vmem:[#allocation2 + $0x50] sm:$0xff] %vm15_vm0, %v969_v34  ;;  %27 = vst.msk [vmem:[#allocation2 + $0x58] sm:$0xff] %vm15_vm0, %v969_v34  ;;  %v517_v41 = vand.u32 65535, %v1230_v56  ;;  %v545_v56 = vand.u32 65535, %v1246_v8  ;;  %v559_v9 = vand.u32 65535, %v1265_v25  ;;  %v573_v8 = vand.u32 65535, %v1262_v24 }
  0xc8   :  { %689 = vmin.xlane.f32.xlu0 %v1341_v15  ;;  %28 = vst.msk [vmem:[#allocation2 + $0x60] sm:$0xff] %vm15_vm0, %v969_v34  ;;  %29 = vst.msk [vmem:[#allocation2 + $0x68] sm:$0xff] %vm15_vm0, %v969_v34  ;;  %v253_v15 = vcvt.s32.f32 %v251_v28  ;;  %v309_v28 = vcvt.s32.f32 %v307_v31  ;;  %v337_v31 = vcvt.s32.f32 %v335_v54  ;;  %v587_v25 = vand.u32 65535, %v1281_v49 }
  0xc9   :  { %30 = vst.msk [vmem:[#allocation2 + $0x70] sm:$0xff] %vm15_vm0, %v969_v34  ;;  %31 = vst.msk [vmem:[#allocation2 + $0x78] sm:$0xff] %vm15_vm0, %v969_v34  ;;  %v601_v24 = vand.u32 65535, %v1278_v48  ;;  %v615_v49 = vand.u32 65535, %v1297_v16  ;;  %v643_v16 = vand.u32 65535, %v1313_v63  ;;  %v671_v63 = vand.u32 65535, %v1329_v33 }
  0xca   :  { %32 = vst.msk [vmem:[#allocation2 + $0x80] sm:$0xff] %vm15_vm0, %v969_v34  ;;  %33 = vst.msk [vmem:[#allocation2 + $0x88] sm:$0xff] %vm15_vm0, %v969_v34 }
  0xcb   :  { %34 = vst.msk [vmem:[#allocation2 + $0x90] sm:$0xff] %vm15_vm0, %v969_v34  ;;  %35 = vst.msk [vmem:[#allocation2 + $0x98] sm:$0xff] %vm15_vm0, %v969_v34 }
  0xcc   :  { %36 = vst.msk [vmem:[#allocation2 + $0xa0] sm:$0xff] %vm15_vm0, %v969_v34  ;;  %37 = vst.msk [vmem:[#allocation2 + $0xa8] sm:$0xff] %vm15_vm0, %v969_v34 }
  0xcd   :  { %38 = vst.msk [vmem:[#allocation2 + $0xb0] sm:$0xff] %vm15_vm0, %v969_v34  ;;  %39 = vst.msk [vmem:[#allocation2 + $0xb8] sm:$0xff] %vm15_vm0, %v969_v34 }
  0xce   :  { %40 = vst.msk [vmem:[#allocation2 + $0xc0] sm:$0xff] %vm15_vm0, %v969_v34  ;;  %41 = vst.msk [vmem:[#allocation2 + $0xc8] sm:$0xff] %vm15_vm0, %v969_v34 }
  0xcf   :  { %42 = vst.msk [vmem:[#allocation2 + $0xd0] sm:$0xff] %vm15_vm0, %v969_v34  ;;  %43 = vst.msk [vmem:[#allocation2 + $0xd8] sm:$0xff] %vm15_vm0, %v969_v34 }
  0xd0   :  { %44 = vst.msk [vmem:[#allocation2 + $0xe0] sm:$0xff] %vm15_vm0, %v969_v34  ;;  %45 = vst.msk [vmem:[#allocation2 + $0xe8] sm:$0xff] %vm15_vm0, %v969_v34 }
  0xd1   :  { %46 = vst.msk [vmem:[#allocation2 + $0xf0] sm:$0xff] %vm15_vm0, %v969_v34  ;;  %47 = vst.msk [vmem:[#allocation2 + $0xf8] sm:$0xff] %vm15_vm0, %v969_v34 }
 0x115   :  { %v1379_v35 = vpop.xlane.xlu0 %255 }
 0x116   :  { %vm257_vm1 = vcmp.eq.f32.partialorder %v1100_v44, %v1379_v35 }
 0x117   :  { %v258_v55 = vsel %vm257_vm1, %v253_v15, inf }
 0x118   :  { %259 = vmin.xlane.f32.xlu1 %v258_v55 }
 0x119   :  { %v1385_v1 = vpop.xlane.xlu1 %269  ;;  %v1387_v34 = vpop.xlane.xlu0 %283 }
 0x11a   :  { %vm271_vm2 = vcmp.eq.f32.partialorder %v1115_v52, %v1385_v1  ;;  %vm285_vm3 = vcmp.eq.f32.partialorder %v1109_v47, %v1387_v34 }
 0x11b   :  { %v272_v46 = vsel %vm271_vm2, %v267_v39, inf  ;;  %v286_v44 = vsel %vm285_vm3, %v281_v38, inf }
 0x11c   :  { %273 = vmin.xlane.f32.xlu0 %v272_v46  ;;  %287 = vmin.xlane.f32.xlu1 %v286_v44  ;;  %v365_v44 = vcvt.s32.f32 %v363_v62  ;;  %v421_v62 = vcvt.s32.f32 %v419_v14  ;;  %v505_v14 = vcvt.s32.f32 %v503_v42 }
 0x11d   :  { %v1395_v55 = vpop.xlane.xlu1 %311  ;;  %v1397_v15 = vpop.xlane.xlu0 %297 }
 0x11e   :  { %vm313_vm4 = vcmp.eq.f32.partialorder %v1130_v59, %v1395_v55  ;;  %vm299_vm5 = vcmp.eq.f32.partialorder %v1126_v58, %v1397_v15 }
 0x11f   :  { %v314_v47 = vsel %vm313_vm4, %v309_v28, inf  ;;  %v300_v52 = vsel %vm299_vm5, %v295_v23, inf  ;;  %v393_v23 = vcvt.s32.f32 %v391_v6 }
 0x120   :  { %315 = vmin.xlane.f32.xlu1 %v314_v47  ;;  %301 = vmin.xlane.f32.xlu0 %v300_v52  ;;  %v379_v47 = vcvt.s32.f32 %v377_v61  ;;  %v435_v61 = vcvt.s32.f32 %v433_v13  ;;  %v519_v13 = vcvt.s32.f32 %v517_v41 }
 0x121   :  { %v1405_v32 = vpop.xlane.xlu1 %339  ;;  %v1407_v39 = vpop.xlane.xlu0 %325 }
 0x122   :  { %vm341_vm6 = vcmp.eq.f32.partialorder %v1147_v4, %v1405_v32  ;;  %vm327_vm7 = vcmp.eq.f32.partialorder %v1145_v3, %v1407_v39 }
 0x123   :  { %v342_v58 = vsel %vm341_vm6, %v337_v31, inf  ;;  %v328_v59 = vsel %vm327_vm7, %v323_v0, inf  ;;  %v407_v31 = vcvt.s32.f32 %v405_v5 }
 0x124   :  { %343 = vmin.xlane.f32.xlu1 %v342_v58  ;;  %329 = vmin.xlane.f32.xlu0 %v328_v59  ;;  %v449_v59 = vcvt.s32.f32 %v447_v22 }
 0x125   :  { %v1415_v38 = vpop.xlane.xlu1 %367  ;;  %v1417_v46 = vpop.xlane.xlu0 %353 }
 0x126   :  { %vm369_vm8 = vcmp.eq.f32.partialorder %v1162_v11, %v1415_v38  ;;  %vm355_vm9 = vcmp.eq.f32.partialorder %v1158_v10, %v1417_v46 }
 0x127   :  { %v370_v3 = vsel %vm369_vm8, %v365_v44, inf  ;;  %v356_v4 = vsel %vm355_vm9, %v351_v45, inf  ;;  %v477_v45 = vcvt.s32.f32 %v475_v30  ;;  %v589_v30 = vcvt.s32.f32 %v587_v25 }
 0x128   :  { %371 = vmin.xlane.f32.xlu1 %v370_v3  ;;  %357 = vmin.xlane.f32.xlu0 %v356_v4  ;;  %v463_v3 = vcvt.s32.f32 %v461_v21 }
 0x129   :  { %v1425_v54 = vpop.xlane.xlu1 %395  ;;  %v1427_v28 = vpop.xlane.xlu0 %381 }
 0x12a   :  { %vm397_vm10 = vcmp.eq.f32.partialorder %v1179_v20, %v1425_v54  ;;  %vm383_vm11 = vcmp.eq.f32.partialorder %v1177_v19, %v1427_v28 }
 0x12b   :  { %v398_v10 = vsel %vm397_vm10, %v393_v23, inf  ;;  %v384_v11 = vsel %vm383_vm11, %v379_v47, inf  ;;  %v491_v23 = vcvt.s32.f32 %v489_v29 }
 0x12c   :  { %399 = vmin.xlane.f32.xlu1 %v398_v10  ;;  %385 = vmin.xlane.f32.xlu0 %v384_v11  ;;  %v533_v11 = vcvt.s32.f32 %v531_v57 }
 0x12d   :  { %v1435_v52 = vpop.xlane.xlu1 %423  ;;  %v1437_v53 = vpop.xlane.xlu0 %409 }
 0x12e   :  { %vm425_vm12 = vcmp.eq.f32.partialorder %v1194_v27, %v1435_v52  ;;  %vm411_vm13 = vcmp.eq.f32.partialorder %v1190_v26, %v1437_v53 }
 0x12f   :  { %v426_v19 = vsel %vm425_vm12, %v421_v62, inf  ;;  %v412_v20 = vsel %vm411_vm13, %v407_v31, inf  ;;  %v561_v31 = vcvt.s32.f32 %v559_v9  ;;  %v1756_v9 = vld [vmem:[#allocation8_spill] sm:$0xff] }
 0x130   :  { %427 = vmin.xlane.f32.xlu1 %v426_v19  ;;  %413 = vmin.xlane.f32.xlu0 %v412_v20  ;;  %v547_v19 = vcvt.s32.f32 %v545_v56 }
 0x131   :  { %v1445_v0 = vpop.xlane.xlu1 %451  ;;  %v1447_v58 = vpop.xlane.xlu0 %437 }
 0x132   :  { %vm453_vm14 = vcmp.eq.f32.partialorder %v1211_v40, %v1445_v0  ;;  %vm439_vm15 = vcmp.eq.f32.partialorder %v1209_v37, %v1447_v58 }
 0x133   :  { %v454_v26 = vsel %vm453_vm14, %v449_v59, inf  ;;  %v440_v27 = vsel %vm439_vm15, %v435_v61, inf  ;;  %v575_v59 = vcvt.s32.f32 %v573_v8  ;;  %v1751_v61 = vld [vmem:[#allocation4_spill] sm:$0xff]  ;;  %v673_v8 = vcvt.s32.f32 %v671_v63 }
 0x134   :  { %455 = vmin.xlane.f32.xlu1 %v454_v26  ;;  %441 = vmin.xlane.f32.xlu0 %v440_v27  ;;  %v1753_v27 = vld [vmem:[#allocation5_spill] sm:$0xff] }
 0x135   :  { %v1455_v6 = vpop.xlane.xlu1 %479  ;;  %v1457_v44 = vpop.xlane.xlu0 %465  ;;  %v629_v48 = vand.u32 65535, %v1753_v27 }
 0x136   :  { %vm481_vm1 = vcmp.eq.f32.partialorder %v1226_v51, %v1455_v6  ;;  %vm467_vm2 = vcmp.eq.f32.partialorder %v1222_v50, %v1457_v44 }
 0x137   :  { %v482_v37 = vsel %vm481_vm1, %v477_v45, inf  ;;  %v468_v40 = vsel %vm467_vm2, %v463_v3, inf  ;;  %v617_v45 = vcvt.s32.f32 %v615_v49  ;;  %v603_v3 = vcvt.s32.f32 %v601_v24  ;;  %v1760_v49 = vld [vmem:[#allocation12_spill] sm:$0xff] }
 0x138   :  { %483 = vmin.xlane.f32.xlu1 %v482_v37  ;;  %469 = vmin.xlane.f32.xlu0 %v468_v40  ;;  %v1754_v37 = vld [vmem:[#allocation7_spill] sm:$0xff]  ;;  %v1755_v40 = vld [vmem:[#allocation6_spill] sm:$0xff]  ;;  %v631_v56 = vcvt.s32.f32 %v629_v48 }
 0x139   :  { %v1465_v4 = vpop.xlane.xlu1 %507  ;;  %v1467_v5 = vpop.xlane.xlu0 %493 }
 0x13a   :  { %vm509_vm3 = vcmp.eq.f32.partialorder %v1243_v7, %v1465_v4  ;;  %vm495_vm4 = vcmp.eq.f32.partialorder %v1241_v2, %v1467_v5 }
 0x13b   :  { %v510_v50 = vsel %vm509_vm3, %v505_v14, inf  ;;  %v496_v51 = vsel %vm495_vm4, %v491_v23, inf  ;;  %v657_v14 = vand.u32 65535, %v1310_v60 }
 0x13c   :  { %511 = vmin.xlane.f32.xlu1 %v510_v50  ;;  %497 = vmin.xlane.f32.xlu0 %v496_v51  ;;  %v645_v51 = vcvt.s32.f32 %v643_v16 }
 0x13d   :  { %v1475_v47 = vpop.xlane.xlu1 %535  ;;  %v1477_v10 = vpop.xlane.xlu0 %521  ;;  %v659_v25 = vcvt.s32.f32 %v657_v14 }
 0x13e   :  { %vm537_vm5 = vcmp.eq.f32.partialorder %v1258_v18, %v1475_v47  ;;  %vm523_vm6 = vcmp.eq.f32.partialorder %v1254_v17, %v1477_v10 }
 0x13f   :  { %v538_v2 = vsel %vm537_vm5, %v533_v11, inf  ;;  %v524_v7 = vsel %vm523_vm6, %v519_v13, inf }
 0x140   :  { %539 = vmin.xlane.f32.xlu1 %v538_v2  ;;  %525 = vmin.xlane.f32.xlu0 %v524_v7  ;;  %v1757_v2 = vld [vmem:[#allocation9_spill] sm:$0xff] }
 0x141   :  { %v1485_v22 = vpop.xlane.xlu1 %563  ;;  %v1487_v62 = vpop.xlane.xlu0 %549  ;;  %v685_v60 = vand.u32 65535, %v1757_v2 }
 0x142   :  { %vm565_vm7 = vcmp.eq.f32.partialorder %v1275_v43, %v1485_v22  ;;  %vm551_vm8 = vcmp.eq.f32.partialorder %v1273_v36, %v1487_v62  ;;  %v1752_v43 = vld [vmem:[#allocation3_spill] sm:$0xff] }
 0x143   :  { %v566_v17 = vsel %vm565_vm7, %v561_v31, inf  ;;  %v552_v18 = vsel %vm551_vm8, %v547_v19, inf  ;;  %v1758_v31 = vld [vmem:[#allocation11_spill] sm:$0xff]  ;;  %v687_v24 = vcvt.s32.f32 %v685_v60 }
 0x144   :  { %567 = vmin.xlane.f32.xlu1 %v566_v17  ;;  %553 = vmin.xlane.f32.xlu0 %v552_v18 }
 0x145   :  { %v1495_v20 = vpop.xlane.xlu1 %591  ;;  %v1497_v21 = vpop.xlane.xlu0 %577 }
 0x146   :  { %vm593_vm9 = vcmp.eq.f32.partialorder %v1751_v61, %v1495_v20  ;;  %vm579_vm10 = vcmp.eq.f32.partialorder %v1752_v43, %v1497_v21  ;;  %v276_v61 = vcvt.f32.s32 %v1385_v1  ;;  %v346_v1 = vcvt.f32.s32 %v1405_v32 }
 0x147   :  { %v594_v36 = vsel %vm593_vm9, %v589_v30, inf  ;;  %v580_v26 = vsel %vm579_vm10, %v575_v59, inf  ;;  %v262_v59 = vcvt.f32.s32 %v1379_v35 }
 0x148   :  { %595 = vmin.xlane.f32.xlu1 %v594_v36  ;;  %581 = vmin.xlane.f32.xlu0 %v580_v26  ;;  %v290_v26 = vcvt.f32.s32 %v1387_v34  ;;  %v277_v16 = vshll.u32 %v276_v61, 16  ;;  %v347_v32 = vshll.u32 %v346_v1, 16  ;;  %v767_v61 = vld [vmem:[#allocation2 + $0x20] sm:$0xff]  ;;  %v769_v1 = vld [vmem:[#allocation2 + $0x30] sm:$0xff] }
 0x149   :  { %v1505_v29 = vpop.xlane.xlu1 %619  ;;  %v1507_v42 = vpop.xlane.xlu0 %605  ;;  %v263_v36 = vshll.u32 %v262_v59, 16 }
 0x14a   :  { %vm621_vm11 = vcmp.eq.f32.partialorder %v1754_v37, %v1505_v29  ;;  %vm607_vm12 = vcmp.eq.f32.partialorder %v1755_v40, %v1507_v42  ;;  %v763_v37 = vld [vmem:[#allocation2] sm:$0xff] }
 0x14b   :  { %v622_v41 = vsel %vm621_vm11, %v617_v45, inf  ;;  %v608_v57 = vsel %vm607_vm12, %v603_v3, inf  ;;  %v318_v45 = vcvt.f32.s32 %v1395_v55  ;;  %v304_v3 = vcvt.f32.s32 %v1397_v15  ;;  %v764_v15 = vld [vmem:[#allocation2 + $0x8] sm:$0xff] }
 0x14c   :  { %623 = vmin.xlane.f32.xlu1 %v622_v41  ;;  %609 = vmin.xlane.f32.xlu0 %v608_v57  ;;  %v291_v57 = vshll.u32 %v290_v26, 16 }
 0x14d   :  { %v1515_v23 = vpop.xlane.xlu1 %647  ;;  %v1517_v50 = vpop.xlane.xlu0 %633 }
 0x14e   :  { %vm649_vm13 = vcmp.eq.f32.partialorder %v1322_v12, %v1515_v23  ;;  %vm635_vm14 = vcmp.eq.f32.partialorder %v1756_v9, %v1517_v50  ;;  %v1759_v12 = vld [vmem:[#allocation10_spill] sm:$0xff]  ;;  %v305_v9 = vshll.u32 %v304_v3, 16 }
 0x14f   :  { %v650_v11 = vsel %vm649_vm13, %v645_v51, inf  ;;  %v636_v13 = vsel %vm635_vm14, %v631_v56, inf  ;;  %v319_v56 = vshll.u32 %v318_v45, 16 }
 0x150   :  { %651 = vmin.xlane.f32.xlu1 %v650_v11  ;;  %637 = vmin.xlane.f32.xlu0 %v636_v13  ;;  %v332_v11 = vcvt.f32.s32 %v1407_v39  ;;  %v765_v13 = vld [vmem:[#allocation2 + $0x10] sm:$0xff] }
 0x151   :  { %v1524_v7 = vpop.xlane.xlu1 %675  ;;  %v1526_v33 = vpop.xlane.xlu0 %661 }
 0x152   :  { %vm677_vm15 = vcmp.eq.f32.partialorder %v1758_v31, %v1524_v7  ;;  %vm663_vm1 = vcmp.eq.f32.partialorder %v1759_v12, %v1526_v33  ;;  %v374_v31 = vcvt.f32.s32 %v1415_v38 }
 0x153   :  { %v678_v19 = vsel %vm677_vm15, %v673_v8, inf  ;;  %v664_v17 = vsel %vm663_vm1, %v659_v25, inf }
 0x154   :  { %679 = vmin.xlane.f32.xlu1 %v678_v19  ;;  %665 = vmin.xlane.f32.xlu0 %v664_v17 }
 0x155   :  { %v1532_v18 = vpop.xlane.xlu0 %689 }
 0x156   :  { %vm691_vm2 = vcmp.eq.f32.partialorder %v1760_v49, %v1532_v18  ;;  %v360_v49 = vcvt.f32.s32 %v1417_v46 }
 0x157   :  { %v692_v30 = vsel %vm691_vm2, %v687_v24, inf  ;;  %v333_v24 = vshll.u32 %v332_v11, 16 }
 0x158   :  { %693 = vmin.xlane.f32.xlu0 %v692_v30 }
 0x1a5   :  { %v260_v43 = vpop.xlane.xlu1 %259 }
 0x1a6   :  { %v261_v27 = vcvt.f32.s32 %v260_v43  ;;  %v766_v43 = vld [vmem:[#allocation2 + $0x18] sm:$0xff] }
 0x1a8   :  { %v264_v48 = vadd.s32 %v263_v36, %v261_v27 }
 0x1a9   :  { %v288_v40 = vpop.xlane.xlu1 %287  ;;  %v274_v41 = vpop.xlane.xlu0 %273 }
 0x1aa   :  { %vm699_vm3 = vcmp.lt.s32.totalorder %v264_v48, 128  ;;  %v289_v14 = vcvt.f32.s32 %v288_v40  ;;  %v275_v35 = vcvt.f32.s32 %v274_v41  ;;  %v361_v40 = vshll.u32 %v360_v49, 16 }
 0x1ab   :  { %v700_v63 = vsel %vm699_vm3, %v264_v48, 128  ;;  %v375_v48 = vshll.u32 %v374_v31, 16  ;;  %v388_v41 = vcvt.f32.s32 %v1427_v28  ;;  %v458_v49 = vcvt.f32.s32 %v1445_v0 }
 0x1ac   :  { %vm795_vm4 = vcmp.lt.s32.totalorder %v763_v37, %v700_v63  ;;  %v292_v51 = vadd.s32 %v291_v57, %v289_v14  ;;  %v278_v34 = vadd.s32 %v277_v16, %v275_v35  ;;  %v402_v16 = vcvt.f32.s32 %v1425_v54 }
 0x1ad   :  { %v796_v55 = vsel %vm795_vm4, %v763_v37, %v700_v63  ;;  %v316_v2 = vpop.xlane.xlu1 %315  ;;  %v302_v60 = vpop.xlane.xlu0 %301  ;;  %v768_v63 = vld [vmem:[#allocation2 + $0x28] sm:$0xff] }
 0x1ae   :  { %860 = vst.msk [vmem:[#allocation2] sm:$0xff] %vm15_vm0, %v796_v55  ;;  %vm703_vm5 = vcmp.lt.s32.totalorder %v292_v51, 128  ;;  %vm701_vm6 = vcmp.lt.s32.totalorder %v278_v34, 128  ;;  %v317_v8 = vcvt.f32.s32 %v316_v2  ;;  %v303_v25 = vcvt.f32.s32 %v302_v60 }
 0x1af   :  { %v704_v12 = vsel %vm703_vm5, %v292_v51, 128  ;;  %v702_v19 = vsel %vm701_vm6, %v278_v34, 128  ;;  %v389_v60 = vshll.u32 %v388_v41, 16  ;;  %v486_v41 = vcvt.f32.s32 %v1455_v6 }
 0x1b0   :  { %vm799_vm7 = vcmp.lt.s32.totalorder %v765_v13, %v704_v12  ;;  %vm797_vm8 = vcmp.lt.s32.totalorder %v764_v15, %v702_v19  ;;  %v320_v17 = vadd.s32 %v319_v56, %v317_v8  ;;  %v306_v39 = vadd.s32 %v305_v9, %v303_v25 }
 0x1b1   :  { %v800_v30 = vsel %vm799_vm7, %v765_v13, %v704_v12  ;;  %v798_v59 = vsel %vm797_vm8, %v764_v15, %v702_v19  ;;  %v344_v36 = vpop.xlane.xlu1 %343  ;;  %v330_v26 = vpop.xlane.xlu0 %329  ;;  %v403_v56 = vshll.u32 %v402_v16, 16  ;;  %v430_v9 = vcvt.f32.s32 %v1435_v52  ;;  %v771_v13 = vld [vmem:[#allocation2 + $0x40] sm:$0xff]  ;;  %v770_v19 = vld [vmem:[#allocation2 + $0x38] sm:$0xff] }
 0x1b2   :  { %862 = vst.msk [vmem:[#allocation2 + $0x10] sm:$0xff] %vm15_vm0, %v800_v30  ;;  %861 = vst.msk [vmem:[#allocation2 + $0x8] sm:$0xff] %vm15_vm0, %v798_v59  ;;  %vm707_vm9 = vcmp.lt.s32.totalorder %v320_v17, 128  ;;  %vm705_vm10 = vcmp.lt.s32.totalorder %v306_v39, 128  ;;  %v345_v38 = vcvt.f32.s32 %v344_v36  ;;  %v331_v27 = vcvt.f32.s32 %v330_v26 }
 0x1b3   :  { %v708_v45 = vsel %vm707_vm9, %v320_v17, 128  ;;  %v706_v3 = vsel %vm705_vm10, %v306_v39, 128  ;;  %v416_v8 = vcvt.f32.s32 %v1437_v53 }
 0x1b4   :  { %vm803_vm11 = vcmp.lt.s32.totalorder %v767_v61, %v708_v45  ;;  %vm801_vm12 = vcmp.lt.s32.totalorder %v766_v43, %v706_v3  ;;  %v348_v46 = vadd.s32 %v347_v32, %v345_v38  ;;  %v334_v37 = vadd.s32 %v333_v24, %v331_v27 }
 0x1b5   :  { %v895_v57 = vld [vmem:[#allocation2] sm:$0xff]  ;;  %v804_v14 = vsel %vm803_vm11, %v767_v61, %v708_v45  ;;  %v802_v35 = vsel %vm801_vm12, %v766_v43, %v706_v3  ;;  %v372_v51 = vpop.xlane.xlu1 %371  ;;  %v358_v34 = vpop.xlane.xlu0 %357  ;;  %v431_v24 = vshll.u32 %v430_v9, 16  ;;  %v773_v61 = vld [vmem:[#allocation2 + $0x50] sm:$0xff]  ;;  %v417_v26 = vshll.u32 %v416_v8, 16  ;;  %v772_v3 = vld [vmem:[#allocation2 + $0x48] sm:$0xff] }
 0x1b6   :  { %927 = vst.msk [vmem:[%s1730_s2] sm:$0xff] %vm15_vm0, %v895_v57  ;;  %864 = vst.msk [vmem:[#allocation2 + $0x20] sm:$0xff] %vm15_vm0, %v804_v14  ;;  %vm711_vm13 = vcmp.lt.s32.totalorder %v348_v46, 128  ;;  %vm709_vm14 = vcmp.lt.s32.totalorder %v334_v37, 128  ;;  %v373_v54 = vcvt.f32.s32 %v372_v51  ;;  %v359_v28 = vcvt.f32.s32 %v358_v34 }
 0x1b7   :  { %863 = vst.msk [vmem:[#allocation2 + $0x18] sm:$0xff] %vm15_vm0, %v802_v35  ;;  %v712_v11 = vsel %vm711_vm13, %v348_v46, 128  ;;  %v710_v55 = vsel %vm709_vm14, %v334_v37, 128  ;;  %v444_v38 = vcvt.f32.s32 %v1447_v58  ;;  %v775_v35 = vld [vmem:[#allocation2 + $0x60] sm:$0xff]  ;;  %v472_v34 = vcvt.f32.s32 %v1457_v44 }
 0x1b8   :  { %vm807_vm15 = vcmp.lt.s32.totalorder %v769_v1, %v712_v11  ;;  %vm805_vm1 = vcmp.lt.s32.totalorder %v768_v63, %v710_v55  ;;  %v376_v15 = vadd.s32 %v375_v48, %v373_v54  ;;  %v362_v2 = vadd.s32 %v361_v40, %v359_v28 }
 0x1b9   :  { %v897_v25 = vld [vmem:[#allocation2 + $0x10] sm:$0xff]  ;;  %v896_v32 = vld [vmem:[#allocation2 + $0x8] sm:$0xff]  ;;  %v808_v31 = vsel %vm807_vm15, %v769_v1, %v712_v11  ;;  %v806_v12 = vsel %vm805_vm1, %v768_v63, %v710_v55  ;;  %v400_v17 = vpop.xlane.xlu1 %399  ;;  %v386_v39 = vpop.xlane.xlu0 %385  ;;  %v459_v40 = vshll.u32 %v458_v49, 16  ;;  %v445_v51 = vshll.u32 %v444_v38, 16  ;;  %v774_v11 = vld [vmem:[#allocation2 + $0x58] sm:$0xff] }
 0x1ba   :  { %929 = vst.msk [vmem:[%s1730_s2 + $0x10] sm:$0xff] %vm15_vm0, %v897_v25  ;;  %928 = vst.msk [vmem:[%s1730_s2 + $0x8] sm:$0xff] %vm15_vm0, %v896_v32  ;;  %vm715_vm2 = vcmp.lt.s32.totalorder %v376_v15, 128  ;;  %vm713_vm3 = vcmp.lt.s32.totalorder %v362_v2, 128  ;;  %v401_v52 = vcvt.f32.s32 %v400_v17  ;;  %v387_v53 = vcvt.f32.s32 %v386_v39  ;;  %v777_v25 = vld [vmem:[#allocation2 + $0x70] sm:$0xff] }
 0x1bb   :  { %866 = vst.msk [vmem:[#allocation2 + $0x30] sm:$0xff] %vm15_vm0, %v808_v31  ;;  %865 = vst.msk [vmem:[#allocation2 + $0x28] sm:$0xff] %vm15_vm0, %v806_v12  ;;  %v716_v30 = vsel %vm715_vm2, %v376_v15, 128  ;;  %v714_v59 = vsel %vm713_vm3, %v362_v2, 128  ;;  %v487_v15 = vshll.u32 %v486_v41, 16  ;;  %v514_v2 = vcvt.f32.s32 %v1465_v4 }
 0x1bc   :  { %vm811_vm4 = vcmp.lt.s32.totalorder %v771_v13, %v716_v30  ;;  %vm809_vm5 = vcmp.lt.s32.totalorder %v770_v19, %v714_v59  ;;  %v404_v43 = vadd.s32 %v403_v56, %v401_v52  ;;  %v390_v36 = vadd.s32 %v389_v60, %v387_v53 }
 0x1bd   :  { %v899_v27 = vld [vmem:[#allocation2 + $0x20] sm:$0xff]  ;;  %v812_v16 = vsel %vm811_vm4, %v771_v13, %v716_v30  ;;  %v810_v45 = vsel %vm809_vm5, %v770_v19, %v714_v59  ;;  %v428_v46 = vpop.xlane.xlu1 %427  ;;  %v414_v37 = vpop.xlane.xlu0 %413  ;;  %v473_v12 = vshll.u32 %v472_v34, 16  ;;  %v500_v19 = vcvt.f32.s32 %v1467_v5 }
 0x1be   :  { %v898_v48 = vld [vmem:[#allocation2 + $0x18] sm:$0xff]  ;;  %931 = vst.msk [vmem:[%s1730_s2 + $0x20] sm:$0xff] %vm15_vm0, %v899_v27  ;;  %868 = vst.msk [vmem:[#allocation2 + $0x40] sm:$0xff] %vm15_vm0, %v812_v16  ;;  %vm719_vm6 = vcmp.lt.s32.totalorder %v404_v43, 128  ;;  %vm717_vm7 = vcmp.lt.s32.totalorder %v390_v36, 128  ;;  %v429_v0 = vcvt.f32.s32 %v428_v46  ;;  %v415_v58 = vcvt.f32.s32 %v414_v37 }
 0x1bf   :  { %930 = vst.msk [vmem:[%s1730_s2 + $0x18] sm:$0xff] %vm15_vm0, %v898_v48  ;;  %867 = vst.msk [vmem:[#allocation2 + $0x38] sm:$0xff] %vm15_vm0, %v810_v45  ;;  %v720_v57 = vsel %vm719_vm6, %v404_v43, 128  ;;  %v718_v14 = vsel %vm717_vm7, %v390_v36, 128  ;;  %v515_v59 = vshll.u32 %v514_v2, 16  ;;  %v501_v48 = vshll.u32 %v500_v19, 16 }
 0x1c0   :  { %vm815_vm8 = vcmp.lt.s32.totalorder %v773_v61, %v720_v57  ;;  %vm813_vm9 = vcmp.lt.s32.totalorder %v772_v3, %v718_v14  ;;  %v432_v1 = vadd.s32 %v431_v24, %v429_v0  ;;  %v418_v63 = vadd.s32 %v417_v26, %v415_v58  ;;  %v776_v24 = vld [vmem:[#allocation2 + $0x68] sm:$0xff]  ;;  %v779_v26 = vld [vmem:[#allocation2 + $0x80] sm:$0xff]  ;;  %v778_v0 = vld [vmem:[#allocation2 + $0x78] sm:$0xff] }
 0x1c1   :  { %v816_v56 = vsel %vm815_vm8, %v773_v61, %v720_v57  ;;  %v814_v9 = vsel %vm813_vm9, %v772_v3, %v718_v14  ;;  %v456_v55 = vpop.xlane.xlu1 %455  ;;  %v442_v13 = vpop.xlane.xlu0 %441  ;;  %v542_v61 = vcvt.f32.s32 %v1475_v47  ;;  %v528_v16 = vcvt.f32.s32 %v1477_v10 }
 0x1c2   :  { %v901_v54 = vld [vmem:[#allocation2 + $0x30] sm:$0xff]  ;;  %v900_v28 = vld [vmem:[#allocation2 + $0x28] sm:$0xff]  ;;  %870 = vst.msk [vmem:[#allocation2 + $0x50] sm:$0xff] %vm15_vm0, %v816_v56  ;;  %869 = vst.msk [vmem:[#allocation2 + $0x48] sm:$0xff] %vm15_vm0, %v814_v9  ;;  %vm723_vm10 = vcmp.lt.s32.totalorder %v432_v1, 128  ;;  %vm721_vm11 = vcmp.lt.s32.totalorder %v418_v63, 128  ;;  %v457_v6 = vcvt.f32.s32 %v456_v55  ;;  %v443_v44 = vcvt.f32.s32 %v442_v13 }
 0x1c3   :  { %933 = vst.msk [vmem:[%s1730_s2 + $0x30] sm:$0xff] %vm15_vm0, %v901_v54  ;;  %932 = vst.msk [vmem:[%s1730_s2 + $0x28] sm:$0xff] %vm15_vm0, %v900_v28  ;;  %v724_v60 = vsel %vm723_vm10, %v432_v1, 128  ;;  %v722_v8 = vsel %vm721_vm11, %v418_v63, 128  ;;  %v543_v41 = vshll.u32 %v542_v61, 16  ;;  %v570_v57 = vcvt.f32.s32 %v1485_v22  ;;  %v781_v1 = vld [vmem:[#allocation2 + $0x90] sm:$0xff] }
 0x1c4   :  { %vm819_vm12 = vcmp.lt.s32.totalorder %v775_v35, %v724_v60  ;;  %vm817_vm13 = vcmp.lt.s32.totalorder %v774_v11, %v722_v8  ;;  %v460_v32 = vadd.s32 %v459_v40, %v457_v6  ;;  %v446_v31 = vadd.s32 %v445_v51, %v443_v44  ;;  %v780_v55 = vld [vmem:[#allocation2 + $0x88] sm:$0xff]  ;;  %v785_v61 = vld [vmem:[#allocation2 + $0xb0] sm:$0xff] }
 0x1c5   :  { %v903_v17 = vld [vmem:[#allocation2 + $0x40] sm:$0xff]  ;;  %v820_v52 = vsel %vm819_vm12, %v775_v35, %v724_v60  ;;  %v818_v53 = vsel %vm817_vm13, %v774_v11, %v722_v8  ;;  %v484_v49 = vpop.xlane.xlu1 %483  ;;  %v470_v30 = vpop.xlane.xlu0 %469  ;;  %v529_v34 = vshll.u32 %v528_v16, 16  ;;  %v556_v54 = vcvt.f32.s32 %v1487_v62 }
 0x1c6   :  { %v902_v39 = vld [vmem:[#allocation2 + $0x38] sm:$0xff]  ;;  %935 = vst.msk [vmem:[%s1730_s2 + $0x40] sm:$0xff] %vm15_vm0, %v903_v17  ;;  %872 = vst.msk [vmem:[#allocation2 + $0x60] sm:$0xff] %vm15_vm0, %v820_v52  ;;  %vm727_vm14 = vcmp.lt.s32.totalorder %v460_v32, 128  ;;  %vm725_vm15 = vcmp.lt.s32.totalorder %v446_v31, 128  ;;  %v485_v4 = vcvt.f32.s32 %v484_v49  ;;  %v471_v5 = vcvt.f32.s32 %v470_v30  ;;  %v783_v8 = vld [vmem:[#allocation2 + $0xa0] sm:$0xff] }
 0x1c7   :  { %934 = vst.msk [vmem:[%s1730_s2 + $0x38] sm:$0xff] %vm15_vm0, %v902_v39  ;;  %871 = vst.msk [vmem:[#allocation2 + $0x58] sm:$0xff] %vm15_vm0, %v818_v53  ;;  %v728_v43 = vsel %vm727_vm14, %v460_v32, 128  ;;  %v726_v36 = vsel %vm725_vm15, %v446_v31, 128  ;;  %v571_v44 = vshll.u32 %v570_v57, 16  ;;  %v557_v31 = vshll.u32 %v556_v54, 16 }
 0x1c8   :  { %vm823_vm1 = vcmp.lt.s32.totalorder %v777_v25, %v728_v43  ;;  %vm821_vm2 = vcmp.lt.s32.totalorder %v776_v24, %v726_v36  ;;  %v488_v38 = vadd.s32 %v487_v15, %v485_v4  ;;  %v474_v27 = vadd.s32 %v473_v12, %v471_v5  ;;  %v782_v53 = vld [vmem:[#allocation2 + $0x98] sm:$0xff] }
 0x1c9   :  { %v905_v45 = vld [vmem:[#allocation2 + $0x50] sm:$0xff]  ;;  %v904_v3 = vld [vmem:[#allocation2 + $0x48] sm:$0xff]  ;;  %v824_v46 = vsel %vm823_vm1, %v777_v25, %v728_v43  ;;  %v822_v37 = vsel %vm821_vm2, %v776_v24, %v726_v36  ;;  %v512_v58 = vpop.xlane.xlu1 %511  ;;  %v498_v40 = vpop.xlane.xlu0 %497  ;;  %v598_v15 = vcvt.f32.s32 %v1495_v20  ;;  %v584_v12 = vcvt.f32.s32 %v1497_v21  ;;  %v786_v54 = vld [vmem:[#allocation2 + $0xb8] sm:$0xff] }
 0x1ca   :  { %937 = vst.msk [vmem:[%s1730_s2 + $0x50] sm:$0xff] %vm15_vm0, %v905_v45  ;;  %936 = vst.msk [vmem:[%s1730_s2 + $0x48] sm:$0xff] %vm15_vm0, %v904_v3  ;;  %vm731_vm3 = vcmp.lt.s32.totalorder %v488_v38, 128  ;;  %vm729_vm4 = vcmp.lt.s32.totalorder %v474_v27, 128  ;;  %v513_v47 = vcvt.f32.s32 %v512_v58  ;;  %v499_v10 = vcvt.f32.s32 %v498_v40  ;;  %v784_v3 = vld [vmem:[#allocation2 + $0xa8] sm:$0xff] }
 0x1cb   :  { %874 = vst.msk [vmem:[#allocation2 + $0x70] sm:$0xff] %vm15_vm0, %v824_v46  ;;  %873 = vst.msk [vmem:[#allocation2 + $0x68] sm:$0xff] %vm15_vm0, %v822_v37  ;;  %v732_v14 = vsel %vm731_vm3, %v488_v38, 128  ;;  %v730_v35 = vsel %vm729_vm4, %v474_v27, 128  ;;  %v599_v30 = vshll.u32 %v598_v15, 16  ;;  %v626_v4 = vcvt.f32.s32 %v1505_v29 }
 0x1cc   :  { %vm827_vm5 = vcmp.lt.s32.totalorder %v779_v26, %v732_v14  ;;  %vm825_vm6 = vcmp.lt.s32.totalorder %v778_v0, %v730_v35  ;;  %v516_v63 = vadd.s32 %v515_v59, %v513_v47  ;;  %v502_v51 = vadd.s32 %v501_v48, %v499_v10  ;;  %v787_v10 = vld [vmem:[#allocation2 + $0xc0] sm:$0xff] }
 0x1cd   :  { %v907_v28 = vld [vmem:[#allocation2 + $0x60] sm:$0xff]  ;;  %v828_v9 = vsel %vm827_vm5, %v779_v26, %v732_v14  ;;  %v826_v11 = vsel %vm825_vm6, %v778_v0, %v730_v35  ;;  %v540_v13 = vpop.xlane.xlu1 %539  ;;  %v526_v6 = vpop.xlane.xlu0 %525  ;;  %v585_v26 = vshll.u32 %v584_v12, 16  ;;  %v612_v38 = vcvt.f32.s32 %v1507_v42 }
 0x1ce   :  { %v906_v56 = vld [vmem:[#allocation2 + $0x58] sm:$0xff]  ;;  %939 = vst.msk [vmem:[%s1730_s2 + $0x60] sm:$0xff] %vm15_vm0, %v907_v28  ;;  %876 = vst.msk [vmem:[#allocation2 + $0x80] sm:$0xff] %vm15_vm0, %v828_v9  ;;  %vm735_vm7 = vcmp.lt.s32.totalorder %v516_v63, 128  ;;  %vm733_vm8 = vcmp.lt.s32.totalorder %v502_v51, 128  ;;  %v541_v22 = vcvt.f32.s32 %v540_v13  ;;  %v527_v62 = vcvt.f32.s32 %v526_v6  ;;  %v789_v6 = vld [vmem:[#allocation2 + $0xd0] sm:$0xff] }
 0x1cf   :  { %938 = vst.msk [vmem:[%s1730_s2 + $0x58] sm:$0xff] %vm15_vm0, %v906_v56  ;;  %875 = vst.msk [vmem:[#allocation2 + $0x78] sm:$0xff] %vm15_vm0, %v826_v11  ;;  %v736_v2 = vsel %vm735_vm7, %v516_v63, 128  ;;  %v734_v60 = vsel %vm733_vm8, %v502_v51, 128  ;;  %v627_v0 = vshll.u32 %v626_v4, 16  ;;  %v654_v58 = vcvt.f32.s32 %v1515_v23 }
 0x1d0   :  { %vm831_vm9 = vcmp.lt.s32.totalorder %v781_v1, %v736_v2  ;;  %vm829_vm10 = vcmp.lt.s32.totalorder %v780_v55, %v734_v60  ;;  %v544_v25 = vadd.s32 %v543_v41, %v541_v22  ;;  %v530_v32 = vadd.s32 %v529_v34, %v527_v62 }
 0x1d1   :  { %v832_v39 = vsel %vm831_vm9, %v781_v1, %v736_v2  ;;  %v830_v52 = vsel %vm829_vm10, %v780_v55, %v734_v60  ;;  %v568_v24 = vpop.xlane.xlu1 %567  ;;  %v554_v49 = vpop.xlane.xlu0 %553  ;;  %v613_v14 = vshll.u32 %v612_v38, 16  ;;  %v640_v35 = vcvt.f32.s32 %v1517_v50 }
 0x1d2   :  { %v909_v19 = vld [vmem:[#allocation2 + $0x70] sm:$0xff]  ;;  %v908_v17 = vld [vmem:[#allocation2 + $0x68] sm:$0xff]  ;;  %878 = vst.msk [vmem:[#allocation2 + $0x90] sm:$0xff] %vm15_vm0, %v832_v39  ;;  %877 = vst.msk [vmem:[#allocation2 + $0x88] sm:$0xff] %vm15_vm0, %v830_v52  ;;  %vm739_vm11 = vcmp.lt.s32.totalorder %v544_v25, 128  ;;  %vm737_vm12 = vcmp.lt.s32.totalorder %v530_v32, 128  ;;  %v569_v20 = vcvt.f32.s32 %v568_v24  ;;  %v555_v21 = vcvt.f32.s32 %v554_v49 }
 0x1d3   :  { %941 = vst.msk [vmem:[%s1730_s2 + $0x70] sm:$0xff] %vm15_vm0, %v909_v19  ;;  %940 = vst.msk [vmem:[%s1730_s2 + $0x68] sm:$0xff] %vm15_vm0, %v908_v17  ;;  %v740_v5 = vsel %vm739_vm11, %v544_v25, 128  ;;  %v738_v59 = vsel %vm737_vm12, %v530_v32, 128  ;;  %v655_v9 = vshll.u32 %v654_v58, 16  ;;  %v682_v11 = vcvt.f32.s32 %v1524_v7  ;;  %v788_v32 = vld [vmem:[#allocation2 + $0xc8] sm:$0xff] }
 0x1d4   :  { %vm835_vm13 = vcmp.lt.s32.totalorder %v783_v8, %v740_v5  ;;  %vm833_vm14 = vcmp.lt.s32.totalorder %v782_v53, %v738_v59  ;;  %v572_v43 = vadd.s32 %v571_v44, %v569_v20  ;;  %v558_v36 = vadd.s32 %v557_v31, %v555_v21  ;;  %v791_v52 = vld [vmem:[#allocation2 + $0xe0] sm:$0xff] }
 0x1d5   :  { %v911_v27 = vld [vmem:[#allocation2 + $0x80] sm:$0xff]  ;;  %v836_v16 = vsel %vm835_vm13, %v783_v8, %v740_v5  ;;  %v834_v45 = vsel %vm833_vm14, %v782_v53, %v738_v59  ;;  %v596_v46 = vpop.xlane.xlu1 %595  ;;  %v582_v37 = vpop.xlane.xlu0 %581  ;;  %v641_v44 = vshll.u32 %v640_v35, 16  ;;  %v668_v15 = vcvt.f32.s32 %v1526_v33  ;;  %v790_v59 = vld [vmem:[#allocation2 + $0xd8] sm:$0xff] }
 0x1d6   :  { %v910_v48 = vld [vmem:[#allocation2 + $0x78] sm:$0xff]  ;;  %943 = vst.msk [vmem:[%s1730_s2 + $0x80] sm:$0xff] %vm15_vm0, %v911_v27  ;;  %880 = vst.msk [vmem:[#allocation2 + $0xa0] sm:$0xff] %vm15_vm0, %v836_v16  ;;  %vm743_vm15 = vcmp.lt.s32.totalorder %v572_v43, 128  ;;  %vm741_vm1 = vcmp.lt.s32.totalorder %v558_v36, 128  ;;  %v597_v29 = vcvt.f32.s32 %v596_v46  ;;  %v583_v42 = vcvt.f32.s32 %v582_v37  ;;  %v793_v27 = vld [vmem:[#allocation2 + $0xf0] sm:$0xff] }
 0x1d7   :  { %942 = vst.msk [vmem:[%s1730_s2 + $0x78] sm:$0xff] %vm15_vm0, %v910_v48  ;;  %879 = vst.msk [vmem:[#allocation2 + $0x98] sm:$0xff] %vm15_vm0, %v834_v45  ;;  %v744_v40 = vsel %vm743_vm15, %v572_v43, 128  ;;  %v742_v47 = vsel %vm741_vm1, %v558_v36, 128  ;;  %v683_v19 = vshll.u32 %v682_v11, 16  ;;  %v669_v49 = vshll.u32 %v668_v15, 16 }
 0x1d8   :  { %vm839_vm2 = vcmp.lt.s32.totalorder %v785_v61, %v744_v40  ;;  %vm837_vm3 = vcmp.lt.s32.totalorder %v784_v3, %v742_v47  ;;  %v600_v41 = vadd.s32 %v599_v30, %v597_v29  ;;  %v586_v57 = vadd.s32 %v585_v26, %v583_v42  ;;  %v792_v29 = vld [vmem:[#allocation2 + $0xe8] sm:$0xff] }
 0x1d9   :  { %v913_v1 = vld [vmem:[#allocation2 + $0x90] sm:$0xff]  ;;  %v912_v63 = vld [vmem:[#allocation2 + $0x88] sm:$0xff]  ;;  %v840_v51 = vsel %vm839_vm2, %v785_v61, %v744_v40  ;;  %v838_v34 = vsel %vm837_vm3, %v784_v3, %v742_v47  ;;  %v624_v28 = vpop.xlane.xlu1 %623  ;;  %v610_v56 = vpop.xlane.xlu0 %609  ;;  %v696_v20 = vcvt.f32.s32 %v1532_v18 }
 0x1da   :  { %945 = vst.msk [vmem:[%s1730_s2 + $0x90] sm:$0xff] %vm15_vm0, %v913_v1  ;;  %944 = vst.msk [vmem:[%s1730_s2 + $0x88] sm:$0xff] %vm15_vm0, %v912_v63  ;;  %vm747_vm4 = vcmp.lt.s32.totalorder %v600_v41, 128  ;;  %vm745_vm5 = vcmp.lt.s32.totalorder %v586_v57, 128  ;;  %v625_v23 = vcvt.f32.s32 %v624_v28  ;;  %v611_v50 = vcvt.f32.s32 %v610_v56  ;;  %v794_v1 = vld [vmem:[#allocation2 + $0xf8] sm:$0xff] }
 0x1db   :  { %882 = vst.msk [vmem:[#allocation2 + $0xb0] sm:$0xff] %vm15_vm0, %v840_v51  ;;  %881 = vst.msk [vmem:[#allocation2 + $0xa8] sm:$0xff] %vm15_vm0, %v838_v34  ;;  %v748_v55 = vsel %vm747_vm4, %v600_v41, 128  ;;  %v746_v13 = vsel %vm745_vm5, %v586_v57, 128 }
 0x1dc   :  { %vm843_vm6 = vcmp.lt.s32.totalorder %v787_v10, %v748_v55  ;;  %vm841_vm7 = vcmp.lt.s32.totalorder %v786_v54, %v746_v13  ;;  %v628_v22 = vadd.s32 %v627_v0, %v625_v23  ;;  %v614_v62 = vadd.s32 %v613_v14, %v611_v50 }
 0x1dd   :  { %v915_v2 = vld [vmem:[#allocation2 + $0xa0] sm:$0xff]  ;;  %v844_v8 = vsel %vm843_vm6, %v787_v10, %v748_v55  ;;  %v842_v25 = vsel %vm841_vm7, %v786_v54, %v746_v13  ;;  %v652_v31 = vpop.xlane.xlu1 %651  ;;  %v638_v12 = vpop.xlane.xlu0 %637  ;;  %v697_v0 = vshll.u32 %v696_v20, 16 }
 0x1de   :  { %v914_v60 = vld [vmem:[#allocation2 + $0x98] sm:$0xff]  ;;  %947 = vst.msk [vmem:[%s1730_s2 + $0xa0] sm:$0xff] %vm15_vm0, %v915_v2  ;;  %884 = vst.msk [vmem:[#allocation2 + $0xc0] sm:$0xff] %vm15_vm0, %v844_v8  ;;  %vm751_vm8 = vcmp.lt.s32.totalorder %v628_v22, 128  ;;  %vm749_vm9 = vcmp.lt.s32.totalorder %v614_v62, 128  ;;  %v653_v7 = vcvt.f32.s32 %v652_v31  ;;  %v639_v33 = vcvt.f32.s32 %v638_v12 }
 0x1df   :  { %946 = vst.msk [vmem:[%s1730_s2 + $0x98] sm:$0xff] %vm15_vm0, %v914_v60  ;;  %883 = vst.msk [vmem:[#allocation2 + $0xb8] sm:$0xff] %vm15_vm0, %v842_v25  ;;  %v752_v17 = vsel %vm751_vm8, %v628_v22, 128  ;;  %v750_v39 = vsel %vm749_vm9, %v614_v62, 128 }
 0x1e0   :  { %vm847_vm10 = vcmp.lt.s32.totalorder %v789_v6, %v752_v17  ;;  %vm845_vm11 = vcmp.lt.s32.totalorder %v788_v32, %v750_v39  ;;  %v656_v53 = vadd.s32 %v655_v9, %v653_v7  ;;  %v642_v24 = vadd.s32 %v641_v44, %v639_v33 }
 0x1e1   :  { %v848_v4 = vsel %vm847_vm10, %v789_v6, %v752_v17  ;;  %v846_v5 = vsel %vm845_vm11, %v788_v32, %v750_v39  ;;  %v680_v61 = vpop.xlane.xlu1 %679  ;;  %v666_v43 = vpop.xlane.xlu0 %665 }
 0x1e2   :  { %v917_v21 = vld [vmem:[#allocation2 + $0xb0] sm:$0xff]  ;;  %v916_v30 = vld [vmem:[#allocation2 + $0xa8] sm:$0xff]  ;;  %886 = vst.msk [vmem:[#allocation2 + $0xd0] sm:$0xff] %vm15_vm0, %v848_v4  ;;  %885 = vst.msk [vmem:[#allocation2 + $0xc8] sm:$0xff] %vm15_vm0, %v846_v5  ;;  %vm755_vm12 = vcmp.lt.s32.totalorder %v656_v53, 128  ;;  %vm753_vm13 = vcmp.lt.s32.totalorder %v642_v24, 128  ;;  %v681_v18 = vcvt.f32.s32 %v680_v61  ;;  %v667_v36 = vcvt.f32.s32 %v666_v43 }
 0x1e3   :  { %949 = vst.msk [vmem:[%s1730_s2 + $0xb0] sm:$0xff] %vm15_vm0, %v917_v21  ;;  %948 = vst.msk [vmem:[%s1730_s2 + $0xa8] sm:$0xff] %vm15_vm0, %v916_v30  ;;  %v756_v26 = vsel %vm755_vm12, %v656_v53, 128  ;;  %v754_v38 = vsel %vm753_vm13, %v642_v24, 128 }
 0x1e4   :  { %vm851_vm14 = vcmp.lt.s32.totalorder %v791_v52, %v756_v26  ;;  %vm849_vm15 = vcmp.lt.s32.totalorder %v790_v59, %v754_v38  ;;  %v684_v48 = vadd.s32 %v683_v19, %v681_v18  ;;  %v670_v16 = vadd.s32 %v669_v49, %v667_v36 }
 0x1e5   :  { %v919_v45 = vld [vmem:[#allocation2 + $0xc0] sm:$0xff]  ;;  %v852_v46 = vsel %vm851_vm14, %v791_v52, %v756_v26  ;;  %v850_v37 = vsel %vm849_vm15, %v790_v59, %v754_v38  ;;  %v694_v42 = vpop.xlane.xlu0 %693 }
 0x1e6   :  { %v918_v3 = vld [vmem:[#allocation2 + $0xb8] sm:$0xff]  ;;  %951 = vst.msk [vmem:[%s1730_s2 + $0xc0] sm:$0xff] %vm15_vm0, %v919_v45  ;;  %888 = vst.msk [vmem:[#allocation2 + $0xe0] sm:$0xff] %vm15_vm0, %v852_v46  ;;  %vm759_vm1 = vcmp.lt.s32.totalorder %v684_v48, 128  ;;  %vm757_vm2 = vcmp.lt.s32.totalorder %v670_v16, 128  ;;  %v695_v58 = vcvt.f32.s32 %v694_v42 }
 0x1e7   :  { %950 = vst.msk [vmem:[%s1730_s2 + $0xb8] sm:$0xff] %vm15_vm0, %v918_v3  ;;  %887 = vst.msk [vmem:[#allocation2 + $0xd8] sm:$0xff] %vm15_vm0, %v850_v37  ;;  %v760_v40 = vsel %vm759_vm1, %v684_v48, 128  ;;  %v758_v47 = vsel %vm757_vm2, %v670_v16, 128 }
 0x1e8   :  { %vm855_vm3 = vcmp.lt.s32.totalorder %v793_v27, %v760_v40  ;;  %vm853_vm4 = vcmp.lt.s32.totalorder %v792_v29, %v758_v47  ;;  %v698_v10 = vadd.s32 %v697_v0, %v695_v58 }
 0x1e9   :  { %v921_v41 = vld [vmem:[#allocation2 + $0xd0] sm:$0xff]  ;;  %v920_v57 = vld [vmem:[#allocation2 + $0xc8] sm:$0xff]  ;;  %v856_v14 = vsel %vm855_vm3, %v793_v27, %v760_v40  ;;  %v854_v35 = vsel %vm853_vm4, %v792_v29, %v758_v47 }
 0x1ea   :  { %953 = vst.msk [vmem:[%s1730_s2 + $0xd0] sm:$0xff] %vm15_vm0, %v921_v41  ;;  %952 = vst.msk [vmem:[%s1730_s2 + $0xc8] sm:$0xff] %vm15_vm0, %v920_v57  ;;  %vm761_vm5 = vcmp.lt.s32.totalorder %v698_v10, 128 }
 0x1eb   :  { %890 = vst.msk [vmem:[#allocation2 + $0xf0] sm:$0xff] %vm15_vm0, %v856_v14  ;;  %889 = vst.msk [vmem:[#allocation2 + $0xe8] sm:$0xff] %vm15_vm0, %v854_v35  ;;  %v762_v63 = vsel %vm761_vm5, %v698_v10, 128 }
 0x1ec   :  { %vm857_vm6 = vcmp.lt.s32.totalorder %v794_v1, %v762_v63 }
 0x1ed   :  { %v923_v51 = vld [vmem:[#allocation2 + $0xe0] sm:$0xff]  ;;  %v858_v54 = vsel %vm857_vm6, %v794_v1, %v762_v63 }
 0x1ee   :  { %v922_v34 = vld [vmem:[#allocation2 + $0xd8] sm:$0xff]  ;;  %955 = vst.msk [vmem:[%s1730_s2 + $0xe0] sm:$0xff] %vm15_vm0, %v923_v51  ;;  %891 = vst.msk [vmem:[#allocation2 + $0xf8] sm:$0xff] %vm15_vm0, %v858_v54 }
 0x1ef   :  { %954 = vst.msk [vmem:[%s1730_s2 + $0xd8] sm:$0xff] %vm15_vm0, %v922_v34 }
 0x1f2   :  { %v925_v28 = vld [vmem:[#allocation2 + $0xf0] sm:$0xff]  ;;  %v924_v56 = vld [vmem:[#allocation2 + $0xe8] sm:$0xff] }
 0x1f3   :  { %957 = vst.msk [vmem:[%s1730_s2 + $0xf0] sm:$0xff] %vm15_vm0, %v925_v28  ;;  %956 = vst.msk [vmem:[%s1730_s2 + $0xe8] sm:$0xff] %vm15_vm0, %v924_v56 }
 0x1f5   :  { %v926_v23 = vld [vmem:[#allocation2 + $0xf8] sm:$0xff] }
 0x1f6   :  { %958 = vst.msk [vmem:[%s1730_s2 + $0xf8] sm:$0xff] %vm15_vm0, %v926_v23 }

</bundles_post_ra>
